<compile_context>
chip_gen: v7x
topology: tpu7x:2x2x1
jax: 0.10.0
libtpu: 0.0.40
codegen_flags: <defaults>
</compile_context>

<pallas_src>
import functools

import jax
import jax.numpy as jnp
from jax.experimental import pallas as pl
from jax.experimental.pallas import tpu as pltpu


def _dwconv_kernel(x_ref, w_ref, b_ref, o_ref, pad_ref, *, H, W):
    # x_ref  : (1, H, W, Cb)   channels-last input slab            [VMEM]
    # w_ref  : (9, Cb)         flattened 3x3 depthwise filters     [VMEM]
    # b_ref  : (1, Cb)         bias                                [VMEM]
    # o_ref  : (1, H, W, Cb)   output slab                         [VMEM]
    # pad_ref: (H+2, W+2, Cb)  f32 scratch holding the zero-halo tile
    cb = pad_ref.shape[-1]

    # Build the zero halo entirely in VMEM (no extra HBM pass for padding).
    pad_ref[...] = jnp.zeros_like(pad_ref)
    pad_ref[1:H + 1, 1:W + 1, :] = x_ref[0].astype(jnp.float32)

    xp = pad_ref[...]                                   # (H+2, W+2, Cb) f32
    w = w_ref[...].astype(jnp.float32)                  # (9, Cb)

    acc = jnp.zeros((H, W, cb), jnp.float32)
    for kh in range(3):
        for kw in range(3):
            # shifted slab * per-channel lane vector, f32 accumulate
            acc = acc + xp[kh:kh + H, kw:kw + W, :] * w[kh * 3 + kw, :]

    o_ref[0] = (acc + b_ref[0, :].astype(jnp.float32)).astype(o_ref.dtype)


def _choose_c_block(C, H, W, itemsize=4, target_bytes=2 << 20):
    """Largest channel block that divides C, is a multiple of 128 when C is,
    and keeps one (H, W, Cb) f32 slab under ~target_bytes."""
    if C % 128 == 0:
        cands = [c for c in range(128, C + 1, 128) if C % c == 0]
    else:
        cands = [C]
    best = cands[0]
    for c in cands:                       # ascending; keep largest that fits
        if H * W * c * itemsize <= target_bytes:
            best = c
    return best


def dwconv_nhwc(x, weight, bias):
    """Depthwise conv2d (k=3, s=1, p=1, groups=C, bias) on channels-last input.

    x:      (N, H, W, C)
    weight: (C, 1, 3, 3)   (PyTorch grouped-conv layout, O=C, I/groups=1)
    bias:   (C,)
    returns (N, H, W, C)
    """
    N, H, W, C = x.shape
    w = jnp.transpose(weight.reshape(C, 9), (1, 0)).astype(jnp.float32)  # (9, C)
    b = bias.reshape(1, C).astype(jnp.float32)                           # (1, C)

    cb = _choose_c_block(C, H, W)
    n_cb = C // cb

    kern = functools.partial(_dwconv_kernel, H=H, W=W)
    return pl.pallas_call(
        kern,
        out_shape=jax.ShapeDtypeStruct((N, H, W, C), x.dtype),
        grid=(N, n_cb),
        in_specs=[
            pl.BlockSpec((1, H, W, cb), lambda n, c: (n, 0, 0, c)),
            pl.BlockSpec((9, cb), lambda n, c: (0, c)),
            pl.BlockSpec((1, cb), lambda n, c: (0, c)),
        ],
        out_specs=pl.BlockSpec((1, H, W, cb), lambda n, c: (n, 0, 0, c)),
        scratch_shapes=[pltpu.VMEM((H + 2, W + 2, cb), jnp.float32)],
        compiler_params=pltpu.CompilerParams(
            dimension_semantics=("parallel", "parallel")),
    )(x, w, b)


def dwconv(x, weight, bias):
    """NCHW wrapper matching the PyTorch DWConv interface.

    If the surrounding model already keeps activations channels-last, call
    dwconv_nhwc directly and skip the two layout transposes (layout plumbing).
    """
    out = dwconv_nhwc(jnp.transpose(x, (0, 2, 3, 1)), weight, bias)
    return jnp.transpose(out, (0, 3, 1, 2))


if __name__ == "__main__":
    key = jax.random.PRNGKey(0)
    N, C, H, W = 2, 4, 16, 16   # small test shapes; module default dim=768 also works

    kx, kw, kb = jax.random.split(key, 3)
    x = jax.random.normal(kx, (N, C, H, W), dtype=jnp.float32)

    # Deterministic init mirroring nn.Conv2d defaults; fan_in = 9 for depthwise.
    bound = 1.0 / (9.0 ** 0.5)
    weight = jax.random.uniform(kw, (C, 1, 3, 3), jnp.float32, -bound, bound)
    bias = jax.random.uniform(kb, (C,), jnp.float32, -bound, bound)

    out = jax.block_until_ready(dwconv(x, weight, bias))

    # Pure-JAX reference (matches PyTorch nn.Conv2d(dim, dim, 3, 1, 1, groups=dim)).
    ref = jax.lax.conv_general_dilated(
        x, weight, window_strides=(1, 1), padding=((1, 1), (1, 1)),
        dimension_numbers=("NCHW", "OIHW", "NCHW"),
        feature_group_count=C) + bias[None, :, None, None]
    assert out.shape == (N, C, H, W)
    assert jnp.allclose(out, ref, atol=1e-5), float(jnp.max(jnp.abs(out - ref)))

    print("KERNEL_OK")
</pallas_src>

<mosaic_0001>
module attributes {stable_mosaic.version = 11 : i64} {
  func.func @_dwconv_kernel(%arg0: i32, %arg1: i32, %arg2: memref<1x16x16x4xf32, #tpu.memory_space<vmem>>, %arg3: memref<9x4xf32, #tpu.memory_space<vmem>>, %arg4: memref<1x4xf32, #tpu.memory_space<vmem>>, %arg5: memref<1x16x16x4xf32, #tpu.memory_space<vmem>>, %arg6: memref<18x18x4xf32, #tpu.memory_space<vmem>>) attributes {dimension_semantics = [#tpu.dimension_semantics<parallel>, #tpu.dimension_semantics<parallel>], iteration_bounds = array<i64: 2, 1>, scalar_prefetch = 0 : i64, scratch_operands = 1 : i64, tpu.core_type = #tpu.core_type<tc>, window_params = [{transform_indices = @transform_0, window_bounds = array<i64: 1, 16, 16, 4>}, {transform_indices = @transform_1, window_bounds = array<i64: 9, 4>}, {transform_indices = @transform_2, window_bounds = array<i64: 1, 4>}, {transform_indices = @transform_3, window_bounds = array<i64: 1, 16, 16, 4>}]} {
    %cst = arith.constant 0.000000e+00 : f32
    %0 = vector.broadcast %cst : f32 to vector<18x18x4xf32>
    %c0 = arith.constant 0 : index
    %c0_0 = arith.constant 0 : index
    %c0_1 = arith.constant 0 : index
    %1 = vector.load %arg6[%c0, %c0_0, %c0_1] : memref<18x18x4xf32, #tpu.memory_space<vmem>>, vector<18x18x4xf32>
    tpu.vector_store %arg6[%c0, %c0_0, %c0_1], %0 {strides = array<i32>} : memref<18x18x4xf32, #tpu.memory_space<vmem>>, vector<18x18x4xf32>,
    %c0_2 = arith.constant 0 : index
    %c0_3 = arith.constant 0 : index
    %c0_4 = arith.constant 0 : index
    %c0_5 = arith.constant 0 : index
    %2 = vector.load %arg2[%c0_2, %c0_3, %c0_4, %c0_5] : memref<1x16x16x4xf32, #tpu.memory_space<vmem>>, vector<1x16x16x4xf32>
    %3 = vector.shape_cast %2 : vector<1x16x16x4xf32> to vector<16x16x4xf32>
    %c1 = arith.constant 1 : index
    %c1_6 = arith.constant 1 : index
    %c0_7 = arith.constant 0 : index
    %4 = vector.load %arg6[%c1, %c1_6, %c0_7] : memref<18x18x4xf32, #tpu.memory_space<vmem>>, vector<16x16x4xf32>
    tpu.vector_store %arg6[%c1, %c1_6, %c0_7], %3 {strides = array<i32>} : memref<18x18x4xf32, #tpu.memory_space<vmem>>, vector<16x16x4xf32>,
    %c0_8 = arith.constant 0 : index
    %c0_9 = arith.constant 0 : index
    %c0_10 = arith.constant 0 : index
    %5 = vector.load %arg6[%c0_8, %c0_9, %c0_10] : memref<18x18x4xf32, #tpu.memory_space<vmem>>, vector<18x18x4xf32>
    %c0_11 = arith.constant 0 : index
    %c0_12 = arith.constant 0 : index
    %6 = vector.load %arg3[%c0_11, %c0_12] : memref<9x4xf32, #tpu.memory_space<vmem>>, vector<9x4xf32>
    %cst_13 = arith.constant 0.000000e+00 : f32
    %7 = vector.broadcast %cst_13 : f32 to vector<16x16x4xf32>
    %8 = vector.extract_strided_slice %5 {offsets = [0, 0, 0], sizes = [16, 16, 4], strides = [1, 1, 1]} : vector<18x18x4xf32> to vector<16x16x4xf32>
    %9 = vector.extract_strided_slice %6 {offsets = [0, 0], sizes = [1, 4], strides = [1, 1]} : vector<9x4xf32> to vector<1x4xf32>
    %10 = vector.shape_cast %9 : vector<1x4xf32> to vector<4xf32>
    %11 = vector.shape_cast %10 : vector<4xf32> to vector<1x1x4xf32>
    %12 = vector.broadcast %11 : vector<1x1x4xf32> to vector<16x16x4xf32>
    %13 = arith.mulf %8, %12 : vector<16x16x4xf32>
    %14 = arith.addf %7, %13 : vector<16x16x4xf32>
    %15 = vector.extract_strided_slice %5 {offsets = [0, 1, 0], sizes = [16, 16, 4], strides = [1, 1, 1]} : vector<18x18x4xf32> to vector<16x16x4xf32>
    %16 = vector.extract_strided_slice %6 {offsets = [1, 0], sizes = [1, 4], strides = [1, 1]} : vector<9x4xf32> to vector<1x4xf32>
    %17 = vector.shape_cast %16 : vector<1x4xf32> to vector<4xf32>
    %18 = vector.shape_cast %17 : vector<4xf32> to vector<1x1x4xf32>
    %19 = vector.broadcast %18 : vector<1x1x4xf32> to vector<16x16x4xf32>
    %20 = arith.mulf %15, %19 : vector<16x16x4xf32>
    %21 = arith.addf %14, %20 : vector<16x16x4xf32>
    %22 = vector.extract_strided_slice %5 {offsets = [0, 2, 0], sizes = [16, 16, 4], strides = [1, 1, 1]} : vector<18x18x4xf32> to vector<16x16x4xf32>
    %23 = vector.extract_strided_slice %6 {offsets = [2, 0], sizes = [1, 4], strides = [1, 1]} : vector<9x4xf32> to vector<1x4xf32>
    %24 = vector.shape_cast %23 : vector<1x4xf32> to vector<4xf32>
    %25 = vector.shape_cast %24 : vector<4xf32> to vector<1x1x4xf32>
    %26 = vector.broadcast %25 : vector<1x1x4xf32> to vector<16x16x4xf32>
    %27 = arith.mulf %22, %26 : vector<16x16x4xf32>
    %28 = arith.addf %21, %27 : vector<16x16x4xf32>
    %29 = vector.extract_strided_slice %5 {offsets = [1, 0, 0], sizes = [16, 16, 4], strides = [1, 1, 1]} : vector<18x18x4xf32> to vector<16x16x4xf32>
    %30 = vector.extract_strided_slice %6 {offsets = [3, 0], sizes = [1, 4], strides = [1, 1]} : vector<9x4xf32> to vector<1x4xf32>
    %31 = vector.shape_cast %30 : vector<1x4xf32> to vector<4xf32>
    %32 = vector.shape_cast %31 : vector<4xf32> to vector<1x1x4xf32>
    %33 = vector.broadcast %32 : vector<1x1x4xf32> to vector<16x16x4xf32>
    %34 = arith.mulf %29, %33 : vector<16x16x4xf32>
    %35 = arith.addf %28, %34 : vector<16x16x4xf32>
    %36 = vector.extract_strided_slice %5 {offsets = [1, 1, 0], sizes = [16, 16, 4], strides = [1, 1, 1]} : vector<18x18x4xf32> to vector<16x16x4xf32>
    %37 = vector.extract_strided_slice %6 {offsets = [4, 0], sizes = [1, 4], strides = [1, 1]} : vector<9x4xf32> to vector<1x4xf32>
    %38 = vector.shape_cast %37 : vector<1x4xf32> to vector<4xf32>
    %39 = vector.shape_cast %38 : vector<4xf32> to vector<1x1x4xf32>
    %40 = vector.broadcast %39 : vector<1x1x4xf32> to vector<16x16x4xf32>
    %41 = arith.mulf %36, %40 : vector<16x16x4xf32>
    %42 = arith.addf %35, %41 : vector<16x16x4xf32>
    %43 = vector.extract_strided_slice %5 {offsets = [1, 2, 0], sizes = [16, 16, 4], strides = [1, 1, 1]} : vector<18x18x4xf32> to vector<16x16x4xf32>
    %44 = vector.extract_strided_slice %6 {offsets = [5, 0], sizes = [1, 4], strides = [1, 1]} : vector<9x4xf32> to vector<1x4xf32>
    %45 = vector.shape_cast %44 : vector<1x4xf32> to vector<4xf32>
    %46 = vector.shape_cast %45 : vector<4xf32> to vector<1x1x4xf32>
    %47 = vector.broadcast %46 : vector<1x1x4xf32> to vector<16x16x4xf32>
    %48 = arith.mulf %43, %47 : vector<16x16x4xf32>
    %49 = arith.addf %42, %48 : vector<16x16x4xf32>
    %50 = vector.extract_strided_slice %5 {offsets = [2, 0, 0], sizes = [16, 16, 4], strides = [1, 1, 1]} : vector<18x18x4xf32> to vector<16x16x4xf32>
    %51 = vector.extract_strided_slice %6 {offsets = [6, 0], sizes = [1, 4], strides = [1, 1]} : vector<9x4xf32> to vector<1x4xf32>
    %52 = vector.shape_cast %51 : vector<1x4xf32> to vector<4xf32>
    %53 = vector.shape_cast %52 : vector<4xf32> to vector<1x1x4xf32>
    %54 = vector.broadcast %53 : vector<1x1x4xf32> to vector<16x16x4xf32>
    %55 = arith.mulf %50, %54 : vector<16x16x4xf32>
    %56 = arith.addf %49, %55 : vector<16x16x4xf32>
    %57 = vector.extract_strided_slice %5 {offsets = [2, 1, 0], sizes = [16, 16, 4], strides = [1, 1, 1]} : vector<18x18x4xf32> to vector<16x16x4xf32>
    %58 = vector.extract_strided_slice %6 {offsets = [7, 0], sizes = [1, 4], strides = [1, 1]} : vector<9x4xf32> to vector<1x4xf32>
    %59 = vector.shape_cast %58 : vector<1x4xf32> to vector<4xf32>
    %60 = vector.shape_cast %59 : vector<4xf32> to vector<1x1x4xf32>
    %61 = vector.broadcast %60 : vector<1x1x4xf32> to vector<16x16x4xf32>
    %62 = arith.mulf %57, %61 : vector<16x16x4xf32>
    %63 = arith.addf %56, %62 : vector<16x16x4xf32>
    %64 = vector.extract_strided_slice %5 {offsets = [2, 2, 0], sizes = [16, 16, 4], strides = [1, 1, 1]} : vector<18x18x4xf32> to vector<16x16x4xf32>
    %65 = vector.extract_strided_slice %6 {offsets = [8, 0], sizes = [1, 4], strides = [1, 1]} : vector<9x4xf32> to vector<1x4xf32>
    %66 = vector.shape_cast %65 : vector<1x4xf32> to vector<4xf32>
    %67 = vector.shape_cast %66 : vector<4xf32> to vector<1x1x4xf32>
    %68 = vector.broadcast %67 : vector<1x1x4xf32> to vector<16x16x4xf32>
    %69 = arith.mulf %64, %68 : vector<16x16x4xf32>
    %70 = arith.addf %63, %69 : vector<16x16x4xf32>
    %c0_14 = arith.constant 0 : index
    %c0_15 = arith.constant 0 : index
    %71 = vector.load %arg4[%c0_14, %c0_15] : memref<1x4xf32, #tpu.memory_space<vmem>>, vector<1x4xf32>
    %72 = vector.shape_cast %71 : vector<1x4xf32> to vector<4xf32>
    %73 = vector.shape_cast %72 : vector<4xf32> to vector<1x1x4xf32>
    %74 = vector.broadcast %73 : vector<1x1x4xf32> to vector<16x16x4xf32>
    %75 = arith.addf %70, %74 : vector<16x16x4xf32>
    %c0_16 = arith.constant 0 : index
    %c0_17 = arith.constant 0 : index
    %c0_18 = arith.constant 0 : index
    %c0_19 = arith.constant 0 : index
    %76 = vector.load %arg5[%c0_16, %c0_17, %c0_18, %c0_19] : memref<1x16x16x4xf32, #tpu.memory_space<vmem>>, vector<1x16x16x4xf32>
    %77 = vector.shape_cast %76 : vector<1x16x16x4xf32> to vector<16x16x4xf32>
    %78 = vector.shape_cast %75 : vector<16x16x4xf32> to vector<1x16x16x4xf32>
    tpu.vector_store %arg5[%c0_16, %c0_17, %c0_18, %c0_19], %78 {strides = array<i32>} : memref<1x16x16x4xf32, #tpu.memory_space<vmem>>, vector<1x16x16x4xf32>,
    return
  }
  func.func @transform_0(%arg0: i32, %arg1: i32) -> (i32, i32, i32, i32) {
    %c0_i32 = arith.constant 0 : i32
    %c0_i32_0 = arith.constant 0 : i32
    %c0_i32_1 = arith.constant 0 : i32
    return %arg0, %c0_i32, %c0_i32_0, %arg1 : i32, i32, i32, i32
  }
  func.func @transform_1(%arg0: i32, %arg1: i32) -> (i32, i32) {
    %c0_i32 = arith.constant 0 : i32
    %c0_i32_0 = arith.constant 0 : i32
    return %c0_i32, %arg1 : i32, i32
  }
  func.func @transform_2(%arg0: i32, %arg1: i32) -> (i32, i32) {
    %c0_i32 = arith.constant 0 : i32
    %c0_i32_0 = arith.constant 0 : i32
    return %c0_i32, %arg1 : i32, i32
  }
  func.func @transform_3(%arg0: i32, %arg1: i32) -> (i32, i32, i32, i32) {
    %c0_i32 = arith.constant 0 : i32
    %c0_i32_0 = arith.constant 0 : i32
    %c0_i32_1 = arith.constant 0 : i32
    return %arg0, %c0_i32, %c0_i32_0, %arg1 : i32, i32, i32, i32
  }
}

</mosaic_0001>

<bundles_post_ra>
// kernel: tpu_custom_call.1
= control target key start
LH: loop header
LB: loop body
LE: loop exit
PB: predicated region body
PF: predicated region fallthrough
CT: control target
= control target key end

     0   :  { %s2353_s12 = smov 0   ;;  %s2355_s13 = smov 0   ;;  %s4061_s0 = inlined_call_operand.vmem [shape: f32[2,16,16,4], index: 0, kind: input, shape index: {}]   ;;  %s4062_s1 = inlined_call_operand.vmem [shape: f32[9,4], index: 1, kind: input, shape index: {}]   ;;  %s4063_s2 = inlined_call_operand.vmem [shape: f32[1,4], index: 2, kind: input, shape index: {}]   ;;  %s4064_s3 = inlined_call_operand.vmem [shape: f32[2,16,16,4], index: 3, kind: output, shape index: {}]  }
   0x1   :  { %s2357_s14 = smov 0  }
   0x2 LB: > { %s25_s15 = sadd.s32 1, %s2326_s13  ;;  %p2268_p0 = scmp.ge.s32.totalorder %s2330_s14, 1  ;;  %s2330_s14 = sphi %s2357_s14, %s13_s14   ;;  %s2326_s13 = sphi %s2355_s13, %s4088_s13   ;;  %s2322_s12 = sphi %s2353_s12, %s4087_s12  }
   0x3   : > { %p27_p1 = scmp.ge.s32.totalorder %s25_s15, 2  ;;  %p173_p2 = scmp.lt.s32.totalorder %s2330_s14, 3 }
   0x5   : > { %s4090_s15 = smov (%p27_p1, %s25_s15), 0  ;;  %p174_p3 = pnand %p2268_p0, %p173_p2 }
   0x7   : > { %177 = sbr.rel (%p174_p3) target bundleno = 354 (0x162), region = 32 }
   0xe   : > { %vm233_vm0 = vcmask 31744   ;;  %vm236_vm1 = vcmask 25600   ;;  %p210_p4 = scmp.lt.s32.totalorder %s2322_s12, 1  ;;  %v2332_v0 = vmov 0.0   ;;  %v410_v1 = vlaneseq  ;;  %v408_v13 = vld [vmem:[%s4062_s1] sm:$0xff] }
   0xf   : > { %234 = vst.msk [vmem:[#allocation2] sm:$0xff] %vm233_vm0, %v2332_v0  ;;  %235 = vst.msk [vmem:[#allocation2 + $0x8] sm:$0xff] %vm233_vm0, %v2332_v0  ;;  %v2480_v23 = vld [vmem:[%s4062_s1 + $0x8] ss:$0 sm:$0xff]  ;;  %vm578_vm2 = vcmask 1046528   ;;  %vm823_vm3 = vcmask 1045504  }
  0x10   : > { %238 = vst.msk [vmem:[#allocation2 + $0x18] sm:$0xff] %vm233_vm0, %v2332_v0  ;;  %239 = vst.msk [vmem:[#allocation2 + $0x20] sm:$0xff] %vm233_vm0, %v2332_v0  ;;  %s4092_s12 = smov (!%p210_p4, %s2322_s12), 1  ;;  %v2441_v2 = vshrl.u32 %v410_v1, 7 }
  0x11   : > { %241 = vst.msk [vmem:[#allocation2 + $0x30] sm:$0xff] %vm233_vm0, %v2332_v0  ;;  %242 = vst.msk [vmem:[#allocation2 + $0x38] sm:$0xff] %vm233_vm0, %v2332_v0  ;;  %s2277_s16 = sshll.u32 %s4092_s12, 8 }
  0x12   : > { %244 = vst.msk [vmem:[#allocation2 + $0x48] sm:$0xff] %vm233_vm0, %v2332_v0  ;;  %245 = vst.msk [vmem:[#allocation2 + $0x50] sm:$0xff] %vm233_vm0, %v2332_v0  ;;  %s2439_s19 = scalar_lea.vmem %s4061_s0, %s2277_s16  ;;  %v1594_v9 = vsub.s32 7, %v2441_v2  ;;  %v1038_v14 = vsub.s32 4, %v2441_v2  ;;  %v1526_v15 = vsub.s32 6, %v2441_v2  ;;  %v1282_v19 = vsub.s32 5, %v2441_v2  ;;  %s2743_s28 = scalar_lea.vmem %s4064_s3, %s2277_s16 }
  0x13   : > { %247 = vst.msk [vmem:[#allocation2 + $0x60] sm:$0xff] %vm233_vm0, %v2332_v0  ;;  %248 = vst.msk [vmem:[#allocation2 + $0x68] sm:$0xff] %vm233_vm0, %v2332_v0  ;;  %v289_v3 = vld [vmem:[%s2439_s19] sm:$0xff]  ;;  %v290_v4 = vld [vmem:[%s2439_s19 + $0x8] sm:$0xff]  ;;  %v412_v24 = vsub.s32 0, %v2441_v2  ;;  %v480_v25 = vsub.s32 1, %v2441_v2 }
  0x14   : > { %250 = vst.msk [vmem:[#allocation2 + $0x78] sm:$0xff] %vm233_vm0, %v2332_v0  ;;  %251 = vst.msk [vmem:[#allocation2 + $0x80] sm:$0xff] %vm233_vm0, %v2332_v0  ;;  %v291_v5 = vld [vmem:[%s2439_s19 + $0x10] sm:$0xff]  ;;  %v292_v6 = vld [vmem:[%s2439_s19 + $0x18] sm:$0xff]  ;;  %v725_v29 = vsub.s32 2, %v2441_v2  ;;  %v970_v30 = vsub.s32 3, %v2441_v2  ;;  %v2492_v31 = vrot.slane %v408_v13, %v1594_v9  ;;  %v2500_v35 = vrot.slane %v408_v13, %v1038_v14 }
  0x15   : > { %253 = vst.msk [vmem:[#allocation2 + $0x90] sm:$0xff] %vm233_vm0, %v2332_v0  ;;  %254 = vst.msk [vmem:[#allocation2 + $0x98] sm:$0xff] %vm233_vm0, %v2332_v0  ;;  %v293_v7 = vld [vmem:[%s2439_s19 + $0x20] sm:$0xff]  ;;  %v294_v8 = vld [vmem:[%s2439_s19 + $0x28] sm:$0xff]  ;;  %v2502_v36 = vrot.slane %v408_v13, %v1526_v15  ;;  %v2510_v40 = vrot.slane %v408_v13, %v1282_v19  ;;  %v2519_v44 = vrot.slane %v408_v13, %v412_v24 }
  0x16   : > { %256 = vst.msk [vmem:[#allocation2 + $0xa8] sm:$0xff] %vm233_vm0, %v2332_v0  ;;  %257 = vst.msk [vmem:[#allocation2 + $0xb0] sm:$0xff] %vm233_vm0, %v2332_v0  ;;  %v295_v10 = vld [vmem:[%s2439_s19 + $0x30] sm:$0xff]  ;;  %v296_v11 = vld [vmem:[%s2439_s19 + $0x38] sm:$0xff]  ;;  %v2521_v45 = vrot.slane %v408_v13, %v480_v25  ;;  %v2527_v47 = vrot.slane %v408_v13, %v725_v29  ;;  %v2529_v48 = vrot.slane %v408_v13, %v970_v30 }
  0x17   : > { %259 = vst.msk [vmem:[#allocation2 + $0xc0] sm:$0xff] %vm233_vm0, %v2332_v0  ;;  %260 = vst.msk [vmem:[#allocation2 + $0xc8] sm:$0xff] %vm233_vm0, %v2332_v0  ;;  %v297_v12 = vld [vmem:[%s2439_s19 + $0x40] sm:$0xff]  ;;  %v298_v16 = vld [vmem:[%s2439_s19 + $0x48] sm:$0xff] }
  0x18   : > { %262 = vst.msk [vmem:[#allocation2 + $0xd8] sm:$0xff] %vm233_vm0, %v2332_v0  ;;  %263 = vst.msk [vmem:[#allocation2 + $0xe0] sm:$0xff] %vm233_vm0, %v2332_v0  ;;  %v299_v17 = vld [vmem:[%s2439_s19 + $0x50] sm:$0xff]  ;;  %v300_v18 = vld [vmem:[%s2439_s19 + $0x58] sm:$0xff] }
  0x19   : > { %265 = vst.msk [vmem:[#allocation2 + $0xf0] sm:$0xff] %vm233_vm0, %v2332_v0  ;;  %266 = vst.msk [vmem:[#allocation2 + $0xf8] sm:$0xff] %vm233_vm0, %v2332_v0  ;;  %v301_v20 = vld [vmem:[%s2439_s19 + $0x60] sm:$0xff]  ;;  %v302_v21 = vld [vmem:[%s2439_s19 + $0x68] sm:$0xff] }
  0x1a   : > { %268 = vst.msk [vmem:[#allocation2 + $0x108] sm:$0xff] %vm233_vm0, %v2332_v0  ;;  %269 = vst.msk [vmem:[#allocation2 + $0x110] sm:$0xff] %vm233_vm0, %v2332_v0  ;;  %v303_v22 = vld [vmem:[%s2439_s19 + $0x70] sm:$0xff]  ;;  %v304_v26 = vld [vmem:[%s2439_s19 + $0x78] sm:$0xff] }
  0x1b   : > { %271 = vst.msk [vmem:[#allocation2 + $0x120] sm:$0xff] %vm233_vm0, %v2332_v0  ;;  %272 = vst.msk [vmem:[#allocation2 + $0x128] sm:$0xff] %vm233_vm0, %v2332_v0  ;;  %v305_v27 = vld [vmem:[%s2439_s19 + $0x80] sm:$0xff]  ;;  %v306_v28 = vld [vmem:[%s2439_s19 + $0x88] sm:$0xff] }
  0x1c   : > { %274 = vst.msk [vmem:[#allocation2 + $0x138] sm:$0xff] %vm233_vm0, %v2332_v0  ;;  %275 = vst.msk [vmem:[#allocation2 + $0x140] sm:$0xff] %vm233_vm0, %v2332_v0  ;;  %v307_v32 = vld [vmem:[%s2439_s19 + $0x90] sm:$0xff]  ;;  %v308_v33 = vld [vmem:[%s2439_s19 + $0x98] sm:$0xff] }
  0x1d   : > { %277 = vst.msk [vmem:[#allocation2 + $0x150] sm:$0xff] %vm233_vm0, %v2332_v0  ;;  %278 = vst.msk [vmem:[#allocation2 + $0x158] sm:$0xff] %vm233_vm0, %v2332_v0  ;;  %v309_v34 = vld [vmem:[%s2439_s19 + $0xa0] sm:$0xff]  ;;  %v310_v37 = vld [vmem:[%s2439_s19 + $0xa8] sm:$0xff] }
  0x1e   : > { %280 = vst.msk [vmem:[#allocation2 + $0x168] sm:$0xff] %vm233_vm0, %v2332_v0  ;;  %281 = vst.msk [vmem:[#allocation2 + $0x170] sm:$0xff] %vm233_vm0, %v2332_v0  ;;  %v311_v38 = vld [vmem:[%s2439_s19 + $0xb0] sm:$0xff]  ;;  %v312_v39 = vld [vmem:[%s2439_s19 + $0xb8] sm:$0xff] }
  0x1f   : > { %283 = vst.msk [vmem:[#allocation2 + $0x180] sm:$0xff] %vm233_vm0, %v2332_v0  ;;  %284 = vst.msk [vmem:[#allocation2 + $0x188] sm:$0xff] %vm233_vm0, %v2332_v0  ;;  %v313_v42 = vld [vmem:[%s2439_s19 + $0xc0] sm:$0xff]  ;;  %v314_v43 = vld [vmem:[%s2439_s19 + $0xc8] sm:$0xff] }
  0x20   : > { %286 = vst.msk [vmem:[#allocation2 + $0x198] sm:$0xff] %vm233_vm0, %v2332_v0  ;;  %287 = vst.msk [vmem:[#allocation2 + $0x1a0] sm:$0xff] %vm233_vm0, %v2332_v0  ;;  %v315_v13 = vld [vmem:[%s2439_s19 + $0xd0] sm:$0xff]  ;;  %v317_v19 = vld [vmem:[%s2439_s19 + $0xe0] sm:$0xff] }
  0x21   : > { %237 = vst.msk [vmem:[#allocation2 + $0x10] sm:$0x3] %vm236_vm1, %v2332_v0  ;;  %240 = vst.msk [vmem:[#allocation2 + $0x28] sm:$0x3] %vm236_vm1, %v2332_v0 }
  0x22   : > { %243 = vst.msk [vmem:[#allocation2 + $0x40] sm:$0x3] %vm236_vm1, %v2332_v0  ;;  %246 = vst.msk [vmem:[#allocation2 + $0x58] sm:$0x3] %vm236_vm1, %v2332_v0 }
  0x23   : > { %249 = vst.msk [vmem:[#allocation2 + $0x70] sm:$0x3] %vm236_vm1, %v2332_v0  ;;  %252 = vst.msk [vmem:[#allocation2 + $0x88] sm:$0x3] %vm236_vm1, %v2332_v0 }
  0x24   : > { %255 = vst.msk [vmem:[#allocation2 + $0xa0] sm:$0x3] %vm236_vm1, %v2332_v0  ;;  %258 = vst.msk [vmem:[#allocation2 + $0xb8] sm:$0x3] %vm236_vm1, %v2332_v0 }
  0x25   : > { %261 = vst.msk [vmem:[#allocation2 + $0xd0] sm:$0x3] %vm236_vm1, %v2332_v0  ;;  %264 = vst.msk [vmem:[#allocation2 + $0xe8] sm:$0x3] %vm236_vm1, %v2332_v0 }
  0x26   : > { %267 = vst.msk [vmem:[#allocation2 + $0x100] sm:$0x3] %vm236_vm1, %v2332_v0  ;;  %270 = vst.msk [vmem:[#allocation2 + $0x118] sm:$0x3] %vm236_vm1, %v2332_v0 }
  0x27   : > { %273 = vst.msk [vmem:[#allocation2 + $0x130] sm:$0x3] %vm236_vm1, %v2332_v0  ;;  %276 = vst.msk [vmem:[#allocation2 + $0x148] sm:$0x3] %vm236_vm1, %v2332_v0 }
  0x28   : > { %279 = vst.msk [vmem:[#allocation2 + $0x160] sm:$0x3] %vm236_vm1, %v2332_v0  ;;  %282 = vst.msk [vmem:[#allocation2 + $0x178] sm:$0x3] %vm236_vm1, %v2332_v0 }
  0x29   : > { %285 = vst.msk [vmem:[#allocation2 + $0x190] sm:$0x3] %vm236_vm1, %v2332_v0  ;;  %288 = vst.msk [vmem:[#allocation2 + $0x1a8] sm:$0x3] %vm236_vm1, %v2332_v0 }
  0x2a   : > { %322 = vst.msk [vmem:[#allocation2 + $0x19] sm:$0xff] %vm233_vm0, %v289_v3  ;;  %323 = vst.msk [vmem:[#allocation2 + $0x21] sm:$0xff] %vm233_vm0, %v290_v4 }
  0x2b   : > { %324 = vst.msk [vmem:[#allocation2 + $0x31] sm:$0xff] %vm233_vm0, %v291_v5  ;;  %325 = vst.msk [vmem:[#allocation2 + $0x39] sm:$0xff] %vm233_vm0, %v292_v6 }
  0x2c   : > { %326 = vst.msk [vmem:[#allocation2 + $0x49] sm:$0xff] %vm233_vm0, %v293_v7  ;;  %327 = vst.msk [vmem:[#allocation2 + $0x51] sm:$0xff] %vm233_vm0, %v294_v8 }
  0x2d   : > { %328 = vst.msk [vmem:[#allocation2 + $0x61] sm:$0xff] %vm233_vm0, %v295_v10  ;;  %329 = vst.msk [vmem:[#allocation2 + $0x69] sm:$0xff] %vm233_vm0, %v296_v11 }
  0x2e   : > { %330 = vst.msk [vmem:[#allocation2 + $0x79] sm:$0xff] %vm233_vm0, %v297_v12  ;;  %331 = vst.msk [vmem:[#allocation2 + $0x81] sm:$0xff] %vm233_vm0, %v298_v16 }
  0x2f   : > { %332 = vst.msk [vmem:[#allocation2 + $0x91] sm:$0xff] %vm233_vm0, %v299_v17  ;;  %333 = vst.msk [vmem:[#allocation2 + $0x99] sm:$0xff] %vm233_vm0, %v300_v18  ;;  %v316_v18 = vld [vmem:[%s2439_s19 + $0xd8] sm:$0xff] }
  0x30   : > { %334 = vst.msk [vmem:[#allocation2 + $0xa9] sm:$0xff] %vm233_vm0, %v301_v20  ;;  %335 = vst.msk [vmem:[#allocation2 + $0xb1] sm:$0xff] %vm233_vm0, %v302_v21  ;;  %v318_v20 = vld [vmem:[%s2439_s19 + $0xe8] sm:$0xff] }
  0x31   : > { %336 = vst.msk [vmem:[#allocation2 + $0xc1] sm:$0xff] %vm233_vm0, %v303_v22  ;;  %337 = vst.msk [vmem:[#allocation2 + $0xc9] sm:$0xff] %vm233_vm0, %v304_v26  ;;  %v319_v26 = vld [vmem:[%s2439_s19 + $0xf0] sm:$0xff] }
  0x32   : > { %338 = vst.msk [vmem:[#allocation2 + $0xd9] sm:$0xff] %vm233_vm0, %v305_v27  ;;  %339 = vst.msk [vmem:[#allocation2 + $0xe1] sm:$0xff] %vm233_vm0, %v306_v28  ;;  %v2512_v41 = vld [vmem:[#allocation2 + $0x30] sm:$0xff]  ;;  %v2523_v46 = vld [vmem:[#allocation2 + $0x38] sm:$0xff] }
  0x33   : > { %4073 = vst [vmem:[#allocation3_spill] sm:$0xff] %v2502_v36  ;;  %340 = vst.msk [vmem:[#allocation2 + $0xf1] sm:$0xff] %vm233_vm0, %v307_v32  ;;  %v1596_v49 = vmul.f32 %v2492_v31, %v2512_v41  ;;  %v1840_v50 = vmul.f32 %v2480_v23, %v2512_v41  ;;  %v2535_v51 = vld [vmem:[#allocation2 + $0x48] sm:$0xff]  ;;  %v2539_v52 = vmul.f32 %v2502_v36, %v2512_v41  ;;  %v2551_v56 = vld [vmem:[#allocation2 + $0x50] sm:$0xff] }
  0x34   : > { %341 = vst.msk [vmem:[#allocation2 + $0xf9] sm:$0xff] %vm233_vm0, %v308_v33  ;;  %342 = vst.msk [vmem:[#allocation2 + $0x109] sm:$0xff] %vm233_vm0, %v309_v34  ;;  %v2543_v53 = vmul.f32 %v2492_v31, %v2523_v46  ;;  %v2547_v54 = vmul.f32 %v2480_v23, %v2523_v46  ;;  %v1043_v55 = vmul.f32 %v2500_v35, %v2512_v41  ;;  %v320_v27 = vld [vmem:[%s2439_s19 + $0xf8] sm:$0xff]  ;;  %v354_v28 = vld [vmem:[#allocation2] sm:$0xff] }
  0x35   : > { %343 = vst.msk [vmem:[#allocation2 + $0x111] sm:$0xff] %vm233_vm0, %v310_v37  ;;  %344 = vst.msk [vmem:[#allocation2 + $0x121] sm:$0xff] %vm233_vm0, %v311_v38  ;;  %v1692_v57 = vrot.slane %v1596_v49, 1  ;;  %v1936_v58 = vrot.slane %v1840_v50, 2  ;;  %v2555_v59 = vmul.f32 %v2500_v35, %v2523_v46  ;;  %v1287_v60 = vmul.f32 %v2510_v40, %v2512_v41  ;;  %v355_v34 = vld [vmem:[#allocation2 + $0x8] sm:$0xff]  ;;  %v357_v37 = vld [vmem:[#allocation2 + $0x18] sm:$0xff] }
  0x36   : > { %345 = vst.msk [vmem:[#allocation2 + $0x129] sm:$0xff] %vm233_vm0, %v312_v39  ;;  %4074 = vst [vmem:[#allocation4_spill] sm:$0xff] %v2523_v46  ;;  %v4069_v61 = vrot.slane %v2543_v53, 1  ;;  %v4068_v62 = vrot.slane %v2547_v54, 2  ;;  %v1141_v63 = vrot.slane %v1043_v55, 1  ;;  %v2563_v0 = vmul.f32 %v2510_v40, %v2523_v46  ;;  %v2653_v38 = vld [vmem:[#allocation2 + $0x20] sm:$0xff] }
  0x37   : > { %346 = vst.msk [vmem:[#allocation2 + $0x139] sm:$0xff] %vm233_vm0, %v313_v42  ;;  %347 = vst.msk [vmem:[#allocation2 + $0x141] sm:$0xff] %vm233_vm0, %v314_v43  ;;  %v2567_v1 = vmul.f32 %v2529_v48, %v2512_v41  ;;  %v4067_v2 = vrot.slane %v2555_v59, 1  ;;  %v1385_v3 = vrot.slane %v1287_v60, 2  ;;  %v1599_v4 = vmul.f32 %v2492_v31, %v2535_v51  ;;  %v356_v60 = vld [vmem:[#allocation2 + $0x10] sm:$0x3] }
  0x38   : > { %v2574_v5 = vmul.f32 %v2502_v36, %v2523_v46  ;;  %v4066_v6 = vrot.slane %v2563_v0, 2  ;;  %v2579_v7 = vmul.f32 %v2502_v36, %v2535_v51  ;;  %v2583_v8 = vmul.f32 %v2492_v31, %v2551_v56  ;;  %348 = vst.msk [vmem:[#allocation2 + $0x151] sm:$0xff] %vm233_vm0, %v315_v13  ;;  %349 = vst.msk [vmem:[#allocation2 + $0x159] sm:$0xff] %vm233_vm0, %v316_v18 }
  0x39   : > { %v2588_v9 = vsel %vm578_vm2, %v1692_v57, %v4069_v61  ;;  %v1697_v10 = vrot.slane %v1599_v4, 1  ;;  %v2592_v11 = vmul.f32 %v2480_v23, %v2535_v51  ;;  %v2596_v12 = vmul.f32 %v2480_v23, %v2551_v56  ;;  %350 = vst.msk [vmem:[#allocation2 + $0x169] sm:$0xff] %vm233_vm0, %v317_v19  ;;  %351 = vst.msk [vmem:[#allocation2 + $0x171] sm:$0xff] %vm233_vm0, %v318_v20 }
  0x3a   : > { %v2602_v14 = vsel %vm823_vm3, %v1936_v58, %v4068_v62  ;;  %v2607_v15 = vsel %vm578_vm2, %v1141_v63, %v4067_v2  ;;  %v2612_v16 = vsel %vm823_vm3, %v1385_v3, %v4066_v6  ;;  %v4065_v17 = vrot.slane %v2583_v8, 1  ;;  %352 = vst.msk [vmem:[#allocation2 + $0x181] sm:$0xff] %vm233_vm0, %v319_v26  ;;  %353 = vst.msk [vmem:[#allocation2 + $0x189] sm:$0xff] %vm233_vm0, %v320_v27  ;;  %v2678_v6 = vld [vmem:[#allocation2 + $0x40] sm:$0x3] }
  0x3b   : > { %v2623_v24 = vmul.f32 %v2529_v48, %v2523_v46  ;;  %v2627_v25 = vmul.f32 %v2502_v36, %v2551_v56  ;;  %v2641_v30 = vmul.f32 %v2519_v44, %v2512_v41  ;;  %v2645_v32 = vmul.f32 %v2521_v45, %v2512_v41 }
  0x3c   : > { %v2637_v29 = vsel %vm578_vm2, %v1697_v10, %v4065_v17  ;;  %v2649_v33 = vmul.f32 %v2521_v45, %v2523_v46  ;;  %v482_v39 = vmul.f32 %v2521_v45, %v354_v28  ;;  %v727_v42 = vmul.f32 %v2527_v47, %v354_v28 }
  0x3d   : > { %4075 = vst [vmem:[#allocation5_spill] sm:$0xff] %v2627_v25  ;;  %v2659_v43 = vmul.f32 %v2527_v47, %v2512_v41  ;;  %v2663_v49 = vmul.f32 %v2527_v47, %v2523_v46  ;;  %v414_v50 = vmul.f32 %v2519_v44, %v354_v28  ;;  %v483_v55 = vmul.f32 %v2521_v45, %v355_v34  ;;  %v359_v28 = vld [vmem:[#allocation2 + $0x28] sm:$0x3] }
  0x3e   : > { %v728_v57 = vmul.f32 %v2527_v47, %v355_v34  ;;  %v1040_v58 = vmul.f32 %v2500_v35, %v357_v37  ;;  %v579_v63 = vrot.slane %v482_v39, 1  ;;  %v824_v3 = vrot.slane %v727_v42, 2 }
  0x3f   : > { %v1041_v4 = vmul.f32 %v2500_v35, %v2653_v38  ;;  %v1284_v41 = vmul.f32 %v2510_v40, %v357_v37  ;;  %v580_v10 = vrot.slane %v483_v55, 1  ;;  %v1285_v19 = vmul.f32 %v2510_v40, %v2653_v38 }
  0x40   : > { %v825_v13 = vrot.slane %v728_v57, 2  ;;  %v1136_v18 = vrot.slane %v1040_v58, 1  ;;  %v972_v20 = vmul.f32 %v2529_v48, %v357_v37  ;;  %v484_v17 = vmul.f32 %v2521_v45, %v356_v60 }
  0x41   : > { %v1137_v26 = vrot.slane %v1041_v4, 1  ;;  %v1380_v27 = vrot.slane %v1284_v41, 2  ;;  %v581_v39 = vsel %vm578_vm2, %v579_v63, %v580_v10  ;;  %v415_v55 = vmul.f32 %v2519_v44, %v355_v34 }
  0x42   : > { %v826_v42 = vsel %vm823_vm3, %v824_v3, %v825_v13  ;;  %v729_v57 = vmul.f32 %v2527_v47, %v356_v60  ;;  %v691_v58 = vadd.f32 %v581_v39, %v414_v50  ;;  %v1381_v62 = vrot.slane %v1285_v19, 2 }
  0x43   : > { %v1138_v2 = vsel %vm578_vm2, %v1136_v18, %v1137_v26  ;;  %v582_v61 = vrot.slane %v484_v17, 1  ;;  %v973_v41 = vmul.f32 %v2529_v48, %v2653_v38  ;;  %v1042_v21 = vmul.f32 %v2500_v35, %v359_v28 }
  0x44   : > { %v827_v4 = vrot.slane %v729_v57, 2  ;;  %v1286_v63 = vmul.f32 %v2510_v40, %v359_v28  ;;  %v936_v3 = vadd.f32 %v826_v42, %v691_v58  ;;  %v1598_v34 = vmul.f32 %v2492_v31, %v2678_v6 }
  0x45   : > { %v583_v22 = vsel %vm578_vm2, %v580_v10, %v582_v61  ;;  %v1842_v50 = vmul.f32 %v2480_v23, %v2678_v6  ;;  %v1139_v18 = vrot.slane %v1042_v21, 1  ;;  %v1382_v57 = vsel %vm823_vm3, %v1380_v27, %v1381_v62 }
  0x46   : > { %v692_v60 = vadd.f32 %v583_v22, %v415_v55  ;;  %v828_v17 = vsel %vm823_vm3, %v825_v13, %v827_v4  ;;  %v1383_v19 = vrot.slane %v1286_v63, 2  ;;  %v1004_v39 = vadd.f32 %v972_v20, %v936_v3 }
  0x47   : > { %v1695_v46 = vrot.slane %v1598_v34, 1  ;;  %v4076_v36 = vrot.slane %v2596_v12, 2  ;;  %v4077_v42 = vrot.slane %v2592_v11, 2  ;;  %v1939_v58 = vrot.slane %v1842_v50, 2 }
  0x48   : > { %v937_v10 = vadd.f32 %v828_v17, %v692_v60  ;;  %v416_v25 = vmul.f32 %v2519_v44, %v357_v37  ;;  %v485_v22 = vmul.f32 %v2521_v45, %v357_v37  ;;  %v1248_v13 = vadd.f32 %v1138_v2, %v1004_v39 }
  0x49   : > { %v2699_v61 = vsel %vm823_vm3, %v4077_v42, %v4076_v36  ;;  %v1140_v21 = vsel %vm578_vm2, %v1137_v26, %v1139_v18  ;;  %v1384_v20 = vsel %vm823_vm3, %v1381_v62, %v1383_v19  ;;  %v486_v27 = vmul.f32 %v2521_v45, %v2653_v38 }
  0x4a   : > { %v1005_v55 = vadd.f32 %v973_v41, %v937_v10  ;;  %v584_v4 = vrot.slane %v485_v22, 1  ;;  %v730_v11 = vmul.f32 %v2527_v47, %v357_v37  ;;  %v731_v36 = vmul.f32 %v2527_v47, %v2653_v38 }
  0x4b   : > { %v1492_v63 = vadd.f32 %v1382_v57, %v1248_v13  ;;  %v4078_v3 = vrot.slane %v2543_v53, 1  ;;  %v585_v2 = vrot.slane %v486_v27, 1  ;;  %v487_v26 = vmul.f32 %v2521_v45, %v359_v28  ;;  %v2719_v57 = vld [vmem:[#allocation2 + $0x58] sm:$0x3] }
  0x4c   : > { %v1249_v50 = vadd.f32 %v1140_v21, %v1005_v55  ;;  %v829_v62 = vrot.slane %v730_v11, 2  ;;  %v830_v60 = vrot.slane %v731_v36, 2  ;;  %v732_v17 = vmul.f32 %v2527_v47, %v359_v28 }
  0x4d   : > { %v1696_v34 = vsel %vm578_vm2, %v4078_v3, %v1695_v46  ;;  %v1560_v41 = vadd.f32 %v2539_v52, %v1492_v63  ;;  %v586_v37 = vsel %vm578_vm2, %v584_v4, %v585_v2  ;;  %v587_v18 = vrot.slane %v487_v26, 1 }
  0x4e   : > { %v1045_v19 = vmul.f32 %v2500_v35, %v2678_v6  ;;  %v1493_v39 = vadd.f32 %v1384_v20, %v1249_v50  ;;  %v693_v53 = vadd.f32 %v586_v37, %v416_v25  ;;  %v417_v46 = vmul.f32 %v2519_v44, %v2653_v38  ;;  %v2731_v25 = vld [vmem:[%s4063_s2] ss:$0 sm:$0xff] }
  0x4f   : > { %v832_v42 = vrot.slane %v732_v17, 2  ;;  %v1804_v10 = vadd.f32 %v2588_v9, %v1560_v41  ;;  %v831_v28 = vsel %vm823_vm3, %v829_v62, %v830_v60  ;;  %v588_v52 = vsel %vm578_vm2, %v585_v2, %v587_v18 }
  0x50   : > { %v1289_v22 = vmul.f32 %v2510_v40, %v2678_v6  ;;  %v1561_v13 = vadd.f32 %v2574_v5, %v1493_v39  ;;  %v938_v21 = vadd.f32 %v831_v28, %v693_v53  ;;  %v694_v20 = vadd.f32 %v588_v52, %v417_v46  ;;  %v2777_v53 = vld [vmem:[#allocation2 + $0x60] sm:$0xff]  ;;  %v2779_v46 = vld [vmem:[#allocation2 + $0x68] sm:$0xff] }
  0x51   : > { %v1144_v38 = vrot.slane %v1045_v19, 1  ;;  %v2048_v27 = vadd.f32 %v2602_v14, %v1804_v10  ;;  %v833_v9 = vsel %vm823_vm3, %v830_v60, %v832_v42  ;;  %v1601_v4 = vmul.f32 %v2492_v31, %v2719_v57 }
  0x52   : > { %v1388_v55 = vrot.slane %v1289_v22, 2  ;;  %v1805_v11 = vadd.f32 %v1696_v34, %v1561_v13  ;;  %v1006_v5 = vadd.f32 %v2567_v1, %v938_v21  ;;  %v939_v36 = vadd.f32 %v833_v9, %v694_v20  ;;  %v4083_v20 = vld [vmem:[#allocation5_spill] sm:$0xff] }
  0x53   : > { %v1845_v14 = vmul.f32 %v2480_v23, %v2719_v57  ;;  %v2087_v63 = vadd.f32 %v2731_v25, %v2048_v27  ;;  %v4079_v3 = vrot.slane %v2547_v54, 2  ;;  %v1700_v26 = vrot.slane %v1601_v4, 1 }
  0x54   : > { %v589_v50 = vrot.slane %v2645_v32, 1  ;;  %v1250_v60 = vadd.f32 %v2607_v15, %v1006_v5  ;;  %v1007_v34 = vadd.f32 %v2623_v24, %v939_v36  ;;  %v4080_v1 = vrot.slane %v2555_v59, 1 }
  0x55   : > { %v1940_v2 = vsel %vm823_vm3, %v4079_v3, %v1939_v58  ;;  %2119 = vst.msk [vmem:[%s2743_s28] sm:$0xff] %vm233_vm0, %v2087_v63  ;;  %v4081_v41 = vrot.slane %v2563_v0, 2  ;;  %v590_v58 = vrot.slane %v2649_v33, 1  ;;  %v834_v32 = vrot.slane %v2659_v43, 2 }
  0x56   : > { %v2049_v62 = vadd.f32 %v1940_v2, %v1805_v11  ;;  %v1145_v17 = vsel %vm578_vm2, %v4080_v1, %v1144_v38  ;;  %v835_v37 = vrot.slane %v2663_v49, 2  ;;  %v1494_v24 = vadd.f32 %v2612_v16, %v1250_v60 }
  0x57   : > { %v1389_v54 = vsel %vm823_vm3, %v4081_v41, %v1388_v55  ;;  %v1251_v59 = vadd.f32 %v1145_v17, %v1007_v34  ;;  %v1944_v18 = vrot.slane %v1845_v14, 2  ;;  %v4082_v19 = vrot.slane %v2583_v8, 1  ;;  %v4085_v34 = vld [vmem:[#allocation3_spill] sm:$0xff] }
  0x58   : > { %v2088_v15 = vadd.f32 %v2731_v25, %v2049_v62  ;;  %v591_v0 = vsel %vm578_vm2, %v589_v50, %v590_v58  ;;  %v836_v33 = vsel %vm823_vm3, %v834_v32, %v835_v37  ;;  %v1046_v43 = vmul.f32 %v2500_v35, %v2535_v51 }
  0x59   : > { %v1701_v39 = vsel %vm578_vm2, %v4082_v19, %v1700_v26  ;;  %v1562_v16 = vadd.f32 %v2579_v7, %v1494_v24  ;;  %v1495_v8 = vadd.f32 %v1389_v54, %v1251_v59  ;;  %v695_v42 = vadd.f32 %v591_v0, %v2641_v30  ;;  %v2823_v24 = vld [vmem:[#allocation2 + $0x70] sm:$0x3] }
  0x5a   : > { %2120 = vst.msk [vmem:[%s2743_s28 + $0x8] sm:$0xff] %vm233_vm0, %v2088_v15  ;;  %v1047_v10 = vmul.f32 %v2500_v35, %v2551_v56  ;;  %v976_v28 = vmul.f32 %v2529_v48, %v2535_v51  ;;  %v1146_v52 = vrot.slane %v1046_v43, 1  ;;  %v1290_v22 = vmul.f32 %v2510_v40, %v2535_v51  ;;  %v4086_v43 = vld [vmem:[#allocation4_spill] sm:$0xff] }
  0x5b   : > { %v1291_v13 = vmul.f32 %v2510_v40, %v2551_v56  ;;  %v1806_v21 = vadd.f32 %v2637_v29, %v1562_v16  ;;  %v1563_v7 = vadd.f32 %v4083_v20, %v1495_v8  ;;  %v940_v38 = vadd.f32 %v836_v33, %v695_v42 }
  0x5c   : > { %v1147_v27 = vrot.slane %v1047_v10, 1  ;;  %v1390_v30 = vrot.slane %v1290_v22, 2  ;;  %v1602_v55 = vmul.f32 %v2492_v31, %v2777_v53  ;;  %v2799_v4 = vmul.f32 %v2492_v31, %v2779_v46 }
  0x5d   : > { %v1391_v9 = vrot.slane %v1291_v13, 2  ;;  %v2050_v11 = vadd.f32 %v2699_v61, %v1806_v21  ;;  %v1807_v5 = vadd.f32 %v1701_v39, %v1563_v7  ;;  %v4084_v36 = vrot.slane %v2596_v12, 2 }
  0x5e   : > { %v1008_v14 = vadd.f32 %v976_v28, %v940_v38  ;;  %v1148_v63 = vsel %vm578_vm2, %v1146_v52, %v1147_v27  ;;  %v1702_v3 = vrot.slane %v1602_v55, 1  ;;  %v1703_v2 = vrot.slane %v2799_v4, 1 }
  0x5f   : > { %v1945_v29 = vsel %vm823_vm3, %v4084_v36, %v1944_v18  ;;  %v1846_v26 = vmul.f32 %v2480_v23, %v2777_v53  ;;  %v2089_v50 = vadd.f32 %v2731_v25, %v2050_v11  ;;  %v2812_v60 = vmul.f32 %v2480_v23, %v2779_v46 }
  0x60   : > { %v2051_v62 = vadd.f32 %v1945_v29, %v1807_v5  ;;  %v1252_v61 = vadd.f32 %v1148_v63, %v1008_v14  ;;  %v1392_v12 = vsel %vm823_vm3, %v1390_v30, %v1391_v9  ;;  %v1532_v1 = vmul.f32 %v4085_v34, %v2777_v53 }
  0x61   : > { %v1946_v17 = vrot.slane %v1846_v26, 2  ;;  %v490_v41 = vmul.f32 %v2521_v45, %v2678_v6  ;;  %2121 = vst.msk [vmem:[%s2743_s28 + $0x10] sm:$0xff] %vm233_vm0, %v2089_v50  ;;  %v1947_v15 = vrot.slane %v2812_v60, 2  ;;  %v735_v59 = vmul.f32 %v2527_v47, %v2678_v6 }
  0x62   : > { %v2090_v54 = vadd.f32 %v2731_v25, %v2051_v62  ;;  %v1496_v32 = vadd.f32 %v1392_v12, %v1252_v61  ;;  %v1048_v19 = vmul.f32 %v2500_v35, %v2719_v57  ;;  %v1292_v39 = vmul.f32 %v2510_v40, %v2719_v57  ;;  %v2867_v62 = vld [vmem:[#allocation2 + $0x78] sm:$0xff]  ;;  %v2869_v61 = vld [vmem:[#allocation2 + $0x80] sm:$0xff] }
  0x63   : > { %v592_v18 = vrot.slane %v490_v41, 1  ;;  %v1704_v33 = vsel %vm578_vm2, %v1702_v3, %v1703_v2  ;;  %v419_v16 = vmul.f32 %v2519_v44, %v4086_v43  ;;  %v837_v8 = vrot.slane %v735_v59, 2 }
  0x64   : > { %2122 = vst.msk [vmem:[%s2743_s28 + $0x18] sm:$0xff] %vm233_vm0, %v2090_v54  ;;  %v1564_v0 = vadd.f32 %v1532_v1, %v1496_v32  ;;  %v1149_v10 = vrot.slane %v1048_v19, 1  ;;  %v1393_v6 = vrot.slane %v1292_v39, 2  ;;  %v1604_v28 = vmul.f32 %v2492_v31, %v2823_v24 }
  0x65   : > { %v593_v42 = vsel %vm578_vm2, %v590_v58, %v592_v18  ;;  %v1948_v22 = vsel %vm823_vm3, %v1946_v17, %v1947_v15  ;;  %v977_v21 = vmul.f32 %v2529_v48, %v2551_v56  ;;  %v838_v20 = vsel %vm823_vm3, %v835_v37, %v837_v8 }
  0x66   : > { %v1808_v52 = vadd.f32 %v1704_v33, %v1564_v0  ;;  %v696_v13 = vadd.f32 %v593_v42, %v419_v16  ;;  %v1150_v58 = vsel %vm578_vm2, %v1147_v27, %v1149_v10  ;;  %v1533_v7 = vmul.f32 %v4085_v34, %v2779_v46 }
  0x67   : > { %v1848_v38 = vmul.f32 %v2480_v23, %v2823_v24  ;;  %v1394_v4 = vsel %vm823_vm3, %v1391_v9, %v1393_v6  ;;  %v491_v11 = vmul.f32 %v2521_v45, %v2535_v51  ;;  %v1705_v5 = vrot.slane %v1604_v28, 1 }
  0x68   : > { %v2052_v30 = vadd.f32 %v1948_v22, %v1808_v52  ;;  %v941_v55 = vadd.f32 %v838_v20, %v696_v13  ;;  %v492_v49 = vmul.f32 %v2521_v45, %v2551_v56  ;;  %v736_v37 = vmul.f32 %v2527_v47, %v2535_v51 }
  0x69   : > { %v2861_v27 = vmul.f32 %v2527_v47, %v2551_v56  ;;  %v420_v9 = vmul.f32 %v2519_v44, %v2535_v51  ;;  %v594_v14 = vrot.slane %v491_v11, 1  ;;  %v1949_v63 = vrot.slane %v1848_v38, 2 }
  0x6a   : > { %v2091_v36 = vadd.f32 %v2731_v25, %v2052_v30  ;;  %v1009_v29 = vadd.f32 %v977_v21, %v941_v55  ;;  %v595_v3 = vrot.slane %v492_v49, 1  ;;  %v839_v26 = vrot.slane %v736_v37, 2 }
  0x6b   : > { %v840_v50 = vrot.slane %v2861_v27, 2  ;;  %v1049_v1 = vmul.f32 %v2500_v35, %v2777_v53  ;;  %v1050_v17 = vmul.f32 %v2500_v35, %v2779_v46  ;;  %v1293_v51 = vmul.f32 %v2510_v40, %v2777_v53 }
  0x6c   : > { %2123 = vst.msk [vmem:[%s2743_s28 + $0x20] sm:$0xff] %vm233_vm0, %v2091_v36  ;;  %v1253_v12 = vadd.f32 %v1150_v58, %v1009_v29  ;;  %v1706_v41 = vsel %vm578_vm2, %v1703_v2, %v1705_v5  ;;  %v596_v54 = vsel %vm578_vm2, %v594_v14, %v595_v3  ;;  %v1294_v59 = vmul.f32 %v2510_v40, %v2779_v46  ;;  %v2911_v5 = vld [vmem:[#allocation2 + $0x88] sm:$0x3] }
  0x6d   : > { %v841_v32 = vsel %vm823_vm3, %v839_v26, %v840_v50  ;;  %v697_v19 = vadd.f32 %v596_v54, %v420_v9  ;;  %v1151_v39 = vrot.slane %v1049_v1, 1  ;;  %v1152_v0 = vrot.slane %v1050_v17, 1 }
  0x6e   : > { %v1497_v18 = vadd.f32 %v1394_v4, %v1253_v12  ;;  %v1395_v33 = vrot.slane %v1293_v51, 2  ;;  %v1396_v43 = vrot.slane %v1294_v59, 2  ;;  %v1605_v16 = vmul.f32 %v2492_v31, %v2867_v62 }
  0x6f   : > { %v2888_v8 = vmul.f32 %v2492_v31, %v2869_v61  ;;  %v942_v42 = vadd.f32 %v841_v32, %v697_v19  ;;  %v978_v10 = vmul.f32 %v2529_v48, %v2777_v53  ;;  %v1849_v6 = vmul.f32 %v2480_v23, %v2867_v62 }
  0x70   : > { %v1565_v2 = vadd.f32 %v1533_v7, %v1497_v18  ;;  %v1950_v28 = vsel %vm823_vm3, %v1947_v15, %v1949_v63  ;;  %v1153_v52 = vsel %vm578_vm2, %v1151_v39, %v1152_v0  ;;  %v1534_v22 = vmul.f32 %v4085_v34, %v2867_v62 }
  0x71   : > { %v2902_v13 = vmul.f32 %v2480_v23, %v2869_v61  ;;  %v1010_v20 = vadd.f32 %v978_v10, %v942_v42  ;;  %v1707_v58 = vrot.slane %v1605_v16, 1  ;;  %v1708_v7 = vrot.slane %v2888_v8, 1 }
  0x72   : > { %v1809_v21 = vadd.f32 %v1706_v41, %v1565_v2  ;;  %v1397_v38 = vsel %vm823_vm3, %v1395_v33, %v1396_v43  ;;  %v1951_v30 = vrot.slane %v1849_v6, 2  ;;  %v493_v60 = vmul.f32 %v2521_v45, %v2719_v57 }
  0x73   : > { %v738_v15 = vmul.f32 %v2527_v47, %v2719_v57  ;;  %v1254_v4 = vadd.f32 %v1153_v52, %v1010_v20  ;;  %v1952_v11 = vrot.slane %v2902_v13, 2  ;;  %v1051_v49 = vmul.f32 %v2500_v35, %v2823_v24 }
  0x74   : > { %v2053_v55 = vadd.f32 %v1950_v28, %v1809_v21  ;;  %v421_v37 = vmul.f32 %v2519_v44, %v2551_v56  ;;  %v597_v27 = vrot.slane %v493_v60, 1  ;;  %v1295_v29 = vmul.f32 %v2510_v40, %v2823_v24 }
  0x75   : > { %v842_v36 = vrot.slane %v738_v15, 2  ;;  %v1498_v9 = vadd.f32 %v1397_v38, %v1254_v4  ;;  %v1709_v14 = vsel %vm578_vm2, %v1707_v58, %v1708_v7  ;;  %v1154_v63 = vrot.slane %v1051_v49, 1  ;;  %v2958_v58 = vld [vmem:[#allocation2 + $0x90] sm:$0xff]  ;;  %v2960_v38 = vld [vmem:[#allocation2 + $0x98] sm:$0xff] }
  0x76   : > { %v2092_v57 = vadd.f32 %v2731_v25, %v2053_v55  ;;  %v598_v26 = vsel %vm578_vm2, %v595_v3, %v597_v27  ;;  %v979_v12 = vmul.f32 %v2529_v48, %v2779_v46  ;;  %v1398_v1 = vrot.slane %v1295_v29, 2 }
  0x77   : > { %v1607_v56 = vmul.f32 %v2492_v31, %v2911_v5  ;;  %v1566_v17 = vadd.f32 %v1534_v22, %v1498_v9  ;;  %v1953_v51 = vsel %vm823_vm3, %v1951_v30, %v1952_v11  ;;  %v698_v41 = vadd.f32 %v598_v26, %v421_v37 }
  0x78   : > { %2124 = vst.msk [vmem:[%s2743_s28 + $0x28] sm:$0xff] %vm233_vm0, %v2092_v57  ;;  %v1535_v54 = vmul.f32 %v4085_v34, %v2869_v61  ;;  %v843_v3 = vsel %vm823_vm3, %v840_v50, %v842_v36  ;;  %v1155_v32 = vsel %vm578_vm2, %v1152_v0, %v1154_v63  ;;  %v1851_v59 = vmul.f32 %v2480_v23, %v2911_v5 }
  0x79   : > { %v494_v18 = vmul.f32 %v2521_v45, %v2777_v53  ;;  %v1810_v19 = vadd.f32 %v1709_v14, %v1566_v17  ;;  %v943_v39 = vadd.f32 %v843_v3, %v698_v41  ;;  %v1399_v33 = vsel %vm823_vm3, %v1396_v43, %v1398_v1 }
  0x7a   : > { %v2944_v16 = vmul.f32 %v2521_v45, %v2779_v46  ;;  %v1710_v2 = vrot.slane %v1607_v56, 1  ;;  %v739_v50 = vmul.f32 %v2527_v47, %v2777_v53  ;;  %v2950_v0 = vmul.f32 %v2527_v47, %v2779_v46 }
  0x7b   : > { %v599_v42 = vrot.slane %v494_v18, 1  ;;  %v2054_v10 = vadd.f32 %v1953_v51, %v1810_v19  ;;  %v1011_v6 = vadd.f32 %v979_v12, %v943_v39  ;;  %v422_v28 = vmul.f32 %v2519_v44, %v2777_v53 }
  0x7c   : > { %v600_v43 = vrot.slane %v2944_v16, 1  ;;  %v1954_v52 = vrot.slane %v1851_v59, 2  ;;  %v844_v22 = vrot.slane %v739_v50, 2  ;;  %v845_v21 = vrot.slane %v2950_v0, 2  ;;  %v3001_v16 = vld [vmem:[#allocation2 + $0xa0] sm:$0x3] }
  0x7d   : > { %v1052_v20 = vmul.f32 %v2500_v35, %v2867_v62  ;;  %v2093_v30 = vadd.f32 %v2731_v25, %v2054_v10  ;;  %v1255_v60 = vadd.f32 %v1155_v32, %v1011_v6  ;;  %v1053_v53 = vmul.f32 %v2500_v35, %v2869_v61 }
  0x7e   : > { %v601_v15 = vsel %vm578_vm2, %v599_v42, %v600_v43  ;;  %v846_v4 = vsel %vm823_vm3, %v844_v22, %v845_v21  ;;  %v980_v49 = vmul.f32 %v2529_v48, %v2867_v62  ;;  %v1296_v37 = vmul.f32 %v2510_v40, %v2867_v62 }
  0x7f   : > { %v699_v55 = vadd.f32 %v601_v15, %v422_v28  ;;  %2125 = vst.msk [vmem:[%s2743_s28 + $0x30] sm:$0xff] %vm233_vm0, %v2093_v30  ;;  %v1499_v27 = vadd.f32 %v1399_v33, %v1255_v60  ;;  %v1156_v36 = vrot.slane %v1052_v20, 1  ;;  %v1157_v29 = vrot.slane %v1053_v53, 1 }
  0x80   : > { %v1297_v57 = vmul.f32 %v2510_v40, %v2869_v61  ;;  %v1400_v14 = vrot.slane %v1296_v37, 2  ;;  %v1608_v63 = vmul.f32 %v2492_v31, %v2958_v58  ;;  %v2979_v26 = vmul.f32 %v2492_v31, %v2960_v38 }
  0x81   : > { %v944_v9 = vadd.f32 %v846_v4, %v699_v55  ;;  %v1567_v12 = vadd.f32 %v1535_v54, %v1499_v27  ;;  %v1711_v1 = vsel %vm578_vm2, %v1708_v7, %v1710_v2  ;;  %v1852_v17 = vmul.f32 %v2480_v23, %v2958_v58 }
  0x82   : > { %v1401_v56 = vrot.slane %v1297_v57, 2  ;;  %v1955_v51 = vsel %vm823_vm3, %v1952_v11, %v1954_v52  ;;  %v1536_v3 = vmul.f32 %v4085_v34, %v2958_v58  ;;  %v2993_v32 = vmul.f32 %v2480_v23, %v2960_v38 }
  0x83   : > { %v1012_v41 = vadd.f32 %v980_v49, %v944_v9  ;;  %v1811_v54 = vadd.f32 %v1711_v1, %v1567_v12  ;;  %v1158_v8 = vsel %vm578_vm2, %v1156_v36, %v1157_v29  ;;  %v1712_v7 = vrot.slane %v1608_v63, 1 }
  0x84   : > { %v1713_v59 = vrot.slane %v2979_v26, 1  ;;  %v1402_v19 = vsel %vm823_vm3, %v1400_v14, %v1401_v56  ;;  %v1956_v13 = vrot.slane %v1852_v17, 2  ;;  %v496_v11 = vmul.f32 %v2521_v45, %v2823_v24 }
  0x85   : > { %v1256_v18 = vadd.f32 %v1158_v8, %v1012_v41  ;;  %v2055_v39 = vadd.f32 %v1955_v51, %v1811_v54  ;;  %v1957_v33 = vrot.slane %v2993_v32, 2  ;;  %v741_v2 = vmul.f32 %v2527_v47, %v2823_v24 }
  0x86   : > { %v1054_v42 = vmul.f32 %v2500_v35, %v2911_v5  ;;  %v423_v0 = vmul.f32 %v2519_v44, %v2779_v46  ;;  %v602_v10 = vrot.slane %v496_v11, 1  ;;  %v1298_v6 = vmul.f32 %v2510_v40, %v2911_v5  ;;  %v3056_v11 = vld [vmem:[#allocation2 + $0xb0] sm:$0xff] }
  0x87   : > { %v1500_v50 = vadd.f32 %v1402_v19, %v1256_v18  ;;  %v2094_v28 = vadd.f32 %v2731_v25, %v2055_v39  ;;  %v1714_v52 = vsel %vm578_vm2, %v1712_v7, %v1713_v59  ;;  %v847_v22 = vrot.slane %v741_v2, 2  ;;  %v3049_v7 = vld [vmem:[#allocation2 + $0xa8] sm:$0xff] }
  0x88   : > { %v1159_v20 = vrot.slane %v1054_v42, 1  ;;  %v603_v30 = vsel %vm578_vm2, %v600_v43, %v602_v10  ;;  %v1403_v60 = vrot.slane %v1298_v6, 2  ;;  %v1610_v15 = vmul.f32 %v2492_v31, %v3001_v16 }
  0x89   : > { %v1568_v24 = vadd.f32 %v1536_v3, %v1500_v50  ;;  %2126 = vst.msk [vmem:[%s2743_s28 + $0x38] sm:$0xff] %vm233_vm0, %v2094_v28  ;;  %v1958_v46 = vsel %vm823_vm3, %v1956_v13, %v1957_v33  ;;  %v700_v53 = vadd.f32 %v603_v30, %v423_v0  ;;  %v981_v55 = vmul.f32 %v2529_v48, %v2869_v61 }
  0x8a   : > { %v1537_v4 = vmul.f32 %v4085_v34, %v2960_v38  ;;  %v848_v43 = vsel %vm823_vm3, %v845_v21, %v847_v22  ;;  %v1160_v37 = vsel %vm578_vm2, %v1157_v29, %v1159_v20  ;;  %v1854_v27 = vmul.f32 %v2480_v23, %v3001_v16 }
  0x8b   : > { %v1812_v49 = vadd.f32 %v1714_v52, %v1568_v24  ;;  %v945_v36 = vadd.f32 %v848_v43, %v700_v53  ;;  %v1404_v57 = vsel %vm823_vm3, %v1401_v56, %v1403_v60  ;;  %v497_v9 = vmul.f32 %v2521_v45, %v2867_v62 }
  0x8c   : > { %v3036_v14 = vmul.f32 %v2521_v45, %v2869_v61  ;;  %v1715_v12 = vrot.slane %v1610_v15, 1  ;;  %v742_v21 = vmul.f32 %v2527_v47, %v2867_v62  ;;  %v3042_v29 = vmul.f32 %v2527_v47, %v2869_v61 }
  0x8d   : > { %v2056_v63 = vadd.f32 %v1958_v46, %v1812_v49  ;;  %v1013_v1 = vadd.f32 %v981_v55, %v945_v36  ;;  %v424_v56 = vmul.f32 %v2519_v44, %v2867_v62  ;;  %v604_v17 = vrot.slane %v497_v9, 1 }
  0x8e   : > { %v605_v51 = vrot.slane %v3036_v14, 1  ;;  %v1959_v3 = vrot.slane %v1854_v27, 2  ;;  %v849_v54 = vrot.slane %v742_v21, 2  ;;  %v850_v8 = vrot.slane %v3042_v29, 2 }
  0x8f   : > { %v2095_v41 = vadd.f32 %v2731_v25, %v2056_v63  ;;  %v1257_v18 = vadd.f32 %v1160_v37, %v1013_v1  ;;  %v1055_v13 = vmul.f32 %v2500_v35, %v2958_v58  ;;  %v1056_v62 = vmul.f32 %v2500_v35, %v2960_v38  ;;  %v3095_v63 = vld [vmem:[#allocation2 + $0xb8] sm:$0x3] }
  0x90   : > { %v606_v19 = vsel %vm578_vm2, %v604_v17, %v605_v51  ;;  %v982_v2 = vmul.f32 %v2529_v48, %v2958_v58  ;;  %v1299_v42 = vmul.f32 %v2510_v40, %v2958_v58  ;;  %v1300_v50 = vmul.f32 %v2510_v40, %v2960_v38 }
  0x91   : > { %2127 = vst.msk [vmem:[%s2743_s28 + $0x40] sm:$0xff] %vm233_vm0, %v2095_v41  ;;  %v701_v39 = vadd.f32 %v606_v19, %v424_v56  ;;  %v1501_v0 = vadd.f32 %v1404_v57, %v1257_v18  ;;  %v851_v10 = vsel %vm823_vm3, %v849_v54, %v850_v8  ;;  %v1161_v6 = vrot.slane %v1055_v13, 1 }
  0x92   : > { %v1162_v28 = vrot.slane %v1056_v62, 1  ;;  %v1405_v22 = vrot.slane %v1299_v42, 2  ;;  %v1406_v20 = vrot.slane %v1300_v50, 2  ;;  %v1611_v24 = vmul.f32 %v2492_v31, %v3049_v7 }
  0x93   : > { %v946_v52 = vadd.f32 %v851_v10, %v701_v39  ;;  %v1569_v30 = vadd.f32 %v1537_v4, %v1501_v0  ;;  %v1716_v60 = vsel %vm578_vm2, %v1713_v59, %v1715_v12  ;;  %v3074_v15 = vmul.f32 %v2492_v31, %v3056_v11 }
  0x94   : > { %v1855_v46 = vmul.f32 %v2480_v23, %v3049_v7  ;;  %v1960_v53 = vsel %vm823_vm3, %v1957_v33, %v1959_v3  ;;  %v1538_v49 = vmul.f32 %v4085_v34, %v3049_v7  ;;  %v3085_v26 = vmul.f32 %v2480_v23, %v3056_v11 }
  0x95   : > { %v1014_v55 = vadd.f32 %v982_v2, %v946_v52  ;;  %v1813_v59 = vadd.f32 %v1716_v60, %v1569_v30  ;;  %v1163_v4 = vsel %vm578_vm2, %v1161_v6, %v1162_v28  ;;  %v1717_v43 = vrot.slane %v1611_v24, 1 }
  0x96   : > { %v1718_v37 = vrot.slane %v3074_v15, 1  ;;  %v1407_v36 = vsel %vm823_vm3, %v1405_v22, %v1406_v20  ;;  %v499_v32 = vmul.f32 %v2521_v45, %v2911_v5  ;;  %v744_v33 = vmul.f32 %v2527_v47, %v2911_v5 }
  0x97   : > { %v1258_v27 = vadd.f32 %v1163_v4, %v1014_v55  ;;  %v2057_v57 = vadd.f32 %v1960_v53, %v1813_v59  ;;  %v1961_v9 = vrot.slane %v1855_v46, 2  ;;  %v1962_v14 = vrot.slane %v3085_v26, 2 }
  0x98   : > { %v1057_v12 = vmul.f32 %v2500_v35, %v3001_v16  ;;  %v425_v29 = vmul.f32 %v2519_v44, %v2869_v61  ;;  %v607_v1 = vrot.slane %v499_v32, 1  ;;  %v852_v56 = vrot.slane %v744_v33, 2  ;;  %v3148_v32 = vld [vmem:[#allocation2 + $0xc8] sm:$0xff] }
  0x99   : > { %v1502_v21 = vadd.f32 %v1407_v36, %v1258_v27  ;;  %v2096_v17 = vadd.f32 %v2731_v25, %v2057_v57  ;;  %v1719_v5 = vsel %vm578_vm2, %v1717_v43, %v1718_v37  ;;  %v1301_v3 = vmul.f32 %v2510_v40, %v3001_v16  ;;  %v3142_v43 = vld [vmem:[#allocation2 + $0xc0] sm:$0xff] }
  0x9a   : > { %v1164_v41 = vrot.slane %v1057_v12, 1  ;;  %v608_v18 = vsel %vm578_vm2, %v605_v51, %v607_v1  ;;  %v983_v19 = vmul.f32 %v2529_v48, %v2960_v38  ;;  %v1613_v61 = vmul.f32 %v2492_v31, %v3095_v63 }
  0x9b   : > { %v1570_v54 = vadd.f32 %v1538_v49, %v1502_v21  ;;  %2128 = vst.msk [vmem:[%s2743_s28 + $0x48] sm:$0xff] %vm233_vm0, %v2096_v17  ;;  %v1963_v13 = vsel %vm823_vm3, %v1961_v9, %v1962_v14  ;;  %v702_v62 = vadd.f32 %v608_v18, %v425_v29  ;;  %v1408_v39 = vrot.slane %v1301_v3, 2 }
  0x9c   : > { %v1539_v2 = vmul.f32 %v4085_v34, %v3056_v11  ;;  %v853_v51 = vsel %vm823_vm3, %v850_v8, %v852_v56  ;;  %v1857_v50 = vmul.f32 %v2480_v23, %v3095_v63  ;;  %v500_v0 = vmul.f32 %v2521_v45, %v2958_v58 }
  0x9d   : > { %v1814_v42 = vadd.f32 %v1719_v5, %v1570_v54  ;;  %v947_v10 = vadd.f32 %v853_v51, %v702_v62  ;;  %v1165_v6 = vsel %vm578_vm2, %v1162_v28, %v1164_v41  ;;  %v1720_v52 = vrot.slane %v1613_v61, 1  ;;  %v3174_v61 = vld [vmem:[%s4062_s1 + $0x8] ss:$0 sm:$0xff] }
  0x9e   : > { %v3127_v22 = vmul.f32 %v2521_v45, %v2960_v38  ;;  %v426_v30 = vmul.f32 %v2519_v44, %v2958_v58  ;;  %v609_v60 = vrot.slane %v500_v0, 1  ;;  %v745_v23 = vmul.f32 %v2527_v47, %v2958_v58 }
  0x9f   : > { %v2058_v24 = vadd.f32 %v1963_v13, %v1814_v42  ;;  %v1015_v8 = vadd.f32 %v983_v19, %v947_v10  ;;  %v1409_v46 = vsel %vm823_vm3, %v1406_v20, %v1408_v39  ;;  %v3137_v28 = vmul.f32 %v2527_v47, %v2960_v38 }
  0xa0   : > { %v610_v53 = vrot.slane %v3127_v22, 1  ;;  %v1964_v49 = vrot.slane %v1857_v50, 2  ;;  %v854_v59 = vrot.slane %v745_v23, 2  ;;  %v1058_v4 = vmul.f32 %v2500_v35, %v3049_v7 }
  0xa1   : > { %v2097_v55 = vadd.f32 %v2731_v25, %v2058_v24  ;;  %v1259_v27 = vadd.f32 %v1165_v6, %v1015_v8  ;;  %v855_v20 = vrot.slane %v3137_v28, 2  ;;  %v1059_v36 = vmul.f32 %v2500_v35, %v3056_v11  ;;  %v3195_v24 = vld [vmem:[#allocation2 + $0xd0] sm:$0x3] }
  0xa2   : > { %v611_v58 = vsel %vm578_vm2, %v609_v60, %v610_v53  ;;  %v984_v57 = vmul.f32 %v2529_v48, %v3049_v7  ;;  %v1302_v9 = vmul.f32 %v2510_v40, %v3049_v7  ;;  %v3158_v12 = vmul.f32 %v2510_v40, %v3056_v11 }
  0xa3   : > { %2129 = vst.msk [vmem:[%s2743_s28 + $0x50] sm:$0xff] %vm233_vm0, %v2097_v55  ;;  %v703_v33 = vadd.f32 %v611_v58, %v426_v30  ;;  %v1503_v21 = vadd.f32 %v1409_v46, %v1259_v27  ;;  %v856_v29 = vsel %vm823_vm3, %v854_v59, %v855_v20  ;;  %v1166_v1 = vrot.slane %v1058_v4, 1 }
  0xa4   : > { %v1167_v56 = vrot.slane %v1059_v36, 1  ;;  %v1410_v5 = vrot.slane %v1302_v9, 2  ;;  %v1411_v41 = vrot.slane %v3158_v12, 2  ;;  %v1614_v3 = vmul.f32 %v2492_v31, %v3142_v43 }
  0xa5   : > { %v948_v17 = vadd.f32 %v856_v29, %v703_v33  ;;  %v1571_v54 = vadd.f32 %v1539_v2, %v1503_v21  ;;  %v1721_v18 = vsel %vm578_vm2, %v1718_v37, %v1720_v52  ;;  %v3169_v19 = vmul.f32 %v2492_v31, %v3148_v32 }
  0xa6   : > { %v1858_v13 = vmul.f32 %v3174_v61, %v3142_v43  ;;  %v1965_v62 = vsel %vm823_vm3, %v1962_v14, %v1964_v49  ;;  %v1540_v15 = vmul.f32 %v4085_v34, %v3142_v43  ;;  %v3185_v37 = vmul.f32 %v3174_v61, %v3148_v32 }
  0xa7   : > { %v1016_v39 = vadd.f32 %v984_v57, %v948_v17  ;;  %v1815_v2 = vadd.f32 %v1721_v18, %v1571_v54  ;;  %v1168_v42 = vsel %vm578_vm2, %v1166_v1, %v1167_v56  ;;  %v1722_v51 = vrot.slane %v1614_v3, 1 }
  0xa8   : > { %v1723_v50 = vrot.slane %v3169_v19, 1  ;;  %v1412_v10 = vsel %vm823_vm3, %v1410_v5, %v1411_v41  ;;  %v502_v26 = vmul.f32 %v2521_v45, %v3001_v16  ;;  %v747_v14 = vmul.f32 %v2527_v47, %v3001_v16 }
  0xa9   : > { %v1260_v0 = vadd.f32 %v1168_v42, %v1016_v39  ;;  %v2059_v6 = vadd.f32 %v1965_v62, %v1815_v2  ;;  %v1966_v52 = vrot.slane %v1858_v13, 2  ;;  %v1967_v22 = vrot.slane %v3185_v37, 2 }
  0xaa   : > { %v1060_v30 = vmul.f32 %v2500_v35, %v3095_v63  ;;  %v427_v23 = vmul.f32 %v2519_v44, %v2960_v38  ;;  %v612_v8 = vrot.slane %v502_v26, 1  ;;  %v857_v46 = vrot.slane %v747_v14, 2  ;;  %v3248_v14 = vld [vmem:[#allocation2 + $0xe0] sm:$0xff] }
  0xab   : > { %v1504_v60 = vadd.f32 %v1412_v10, %v1260_v0  ;;  %v2098_v28 = vadd.f32 %v2731_v25, %v2059_v6  ;;  %v1724_v16 = vsel %vm578_vm2, %v1722_v51, %v1723_v50  ;;  %v1304_v49 = vmul.f32 %v2510_v40, %v3095_v63  ;;  %v3242_v0 = vld [vmem:[#allocation2 + $0xd8] sm:$0xff] }
  0xac   : > { %v1169_v55 = vrot.slane %v1060_v30, 1  ;;  %v613_v4 = vsel %vm578_vm2, %v610_v53, %v612_v8  ;;  %v985_v27 = vmul.f32 %v2529_v48, %v3056_v11  ;;  %v1616_v38 = vmul.f32 %v2492_v31, %v3195_v24 }
  0xad   : > { %v1572_v59 = vadd.f32 %v1540_v15, %v1504_v60  ;;  %2130 = vst.msk [vmem:[%s2743_s28 + $0x58] sm:$0xff] %vm233_vm0, %v2098_v28  ;;  %v1968_v58 = vsel %vm823_vm3, %v1966_v52, %v1967_v22  ;;  %v704_v36 = vadd.f32 %v613_v4, %v427_v23  ;;  %v1413_v33 = vrot.slane %v1304_v49, 2 }
  0xae   : > { %v1541_v57 = vmul.f32 %v4085_v34, %v3148_v32  ;;  %v858_v53 = vsel %vm823_vm3, %v855_v20, %v857_v46  ;;  %v1860_v12 = vmul.f32 %v3174_v61, %v3195_v24  ;;  %v503_v21 = vmul.f32 %v2521_v45, %v3049_v7 }
  0xaf   : > { %v1816_v9 = vadd.f32 %v1724_v16, %v1572_v59  ;;  %v949_v29 = vadd.f32 %v858_v53, %v704_v36  ;;  %v1170_v1 = vsel %vm578_vm2, %v1167_v56, %v1169_v55  ;;  %v1725_v17 = vrot.slane %v1616_v38, 1 }
  0xb0   : > { %v3227_v5 = vmul.f32 %v2521_v45, %v3056_v11  ;;  %v428_v54 = vmul.f32 %v2519_v44, %v3049_v7  ;;  %v614_v18 = vrot.slane %v503_v21, 1  ;;  %v748_v20 = vmul.f32 %v2527_v47, %v3049_v7 }
  0xb1   : > { %v2060_v3 = vadd.f32 %v1968_v58, %v1816_v9  ;;  %v1017_v13 = vadd.f32 %v985_v27, %v949_v29  ;;  %v1414_v62 = vsel %vm823_vm3, %v1411_v41, %v1413_v33  ;;  %v3237_v56 = vmul.f32 %v2527_v47, %v3056_v11 }
  0xb2   : > { %v615_v39 = vrot.slane %v3227_v5, 1  ;;  %v1969_v2 = vrot.slane %v1860_v12, 2  ;;  %v859_v42 = vrot.slane %v748_v20, 2  ;;  %v1061_v51 = vmul.f32 %v2500_v35, %v3142_v43 }
  0xb3   : > { %v2099_v15 = vadd.f32 %v2731_v25, %v2060_v3  ;;  %v1261_v10 = vadd.f32 %v1170_v1, %v1017_v13  ;;  %v860_v41 = vrot.slane %v3237_v56, 2  ;;  %v1062_v26 = vmul.f32 %v2500_v35, %v3148_v32  ;;  %v3287_v3 = vld [vmem:[#allocation2 + $0xe8] sm:$0x3] }
  0xb4   : > { %v616_v7 = vsel %vm578_vm2, %v614_v18, %v615_v39  ;;  %v986_v52 = vmul.f32 %v2529_v48, %v3142_v43  ;;  %v1305_v30 = vmul.f32 %v2510_v40, %v3142_v43  ;;  %v1306_v60 = vmul.f32 %v2510_v40, %v3148_v32 }
  0xb5   : > { %2131 = vst.msk [vmem:[%s2743_s28 + $0x60] sm:$0xff] %vm233_vm0, %v2099_v15  ;;  %v705_v6 = vadd.f32 %v616_v7, %v428_v54  ;;  %v1505_v23 = vadd.f32 %v1414_v62, %v1261_v10  ;;  %v861_v8 = vsel %vm823_vm3, %v859_v42, %v860_v41  ;;  %v1171_v46 = vrot.slane %v1061_v51, 1 }
  0xb6   : > { %v1172_v28 = vrot.slane %v1062_v26, 1  ;;  %v1415_v55 = vrot.slane %v1305_v30, 2  ;;  %v1416_v49 = vrot.slane %v1306_v60, 2  ;;  %v1617_v59 = vmul.f32 %v2492_v31, %v3242_v0 }
  0xb7   : > { %v950_v16 = vadd.f32 %v861_v8, %v705_v6  ;;  %v1573_v4 = vadd.f32 %v1541_v57, %v1505_v23  ;;  %v1726_v27 = vsel %vm578_vm2, %v1723_v50, %v1725_v17  ;;  %v3266_v38 = vmul.f32 %v2492_v31, %v3248_v14 }
  0xb8   : > { %v1861_v58 = vmul.f32 %v3174_v61, %v3242_v0  ;;  %v1970_v36 = vsel %vm823_vm3, %v1967_v22, %v1969_v2  ;;  %v1542_v9 = vmul.f32 %v4085_v34, %v3242_v0  ;;  %v3277_v19 = vmul.f32 %v3174_v61, %v3248_v14 }
  0xb9   : > { %v1018_v33 = vadd.f32 %v986_v52, %v950_v16  ;;  %v1817_v50 = vadd.f32 %v1726_v27, %v1573_v4  ;;  %v1173_v57 = vsel %vm578_vm2, %v1171_v46, %v1172_v28  ;;  %v1727_v53 = vrot.slane %v1617_v59, 1 }
  0xba   : > { %v1728_v12 = vrot.slane %v3266_v38, 1  ;;  %v1417_v29 = vsel %vm823_vm3, %v1415_v55, %v1416_v49  ;;  %v505_v37 = vmul.f32 %v2521_v45, %v3095_v63  ;;  %v750_v22 = vmul.f32 %v2527_v47, %v3095_v63 }
  0xbb   : > { %v1262_v21 = vadd.f32 %v1173_v57, %v1018_v33  ;;  %v2061_v1 = vadd.f32 %v1970_v36, %v1817_v50  ;;  %v1971_v17 = vrot.slane %v1861_v58, 2  ;;  %v1972_v5 = vrot.slane %v3277_v19, 2 }
  0xbc   : > { %v1063_v54 = vmul.f32 %v2500_v35, %v3195_v24  ;;  %v429_v20 = vmul.f32 %v2519_v44, %v3056_v11  ;;  %v617_v13 = vrot.slane %v505_v37, 1  ;;  %v862_v62 = vrot.slane %v750_v22, 2  ;;  %v3340_v22 = vld [vmem:[#allocation2 + $0xf8] sm:$0xff] }
  0xbd   : > { %v1506_v18 = vadd.f32 %v1417_v29, %v1262_v21  ;;  %v2100_v56 = vadd.f32 %v2731_v25, %v2061_v1  ;;  %v1729_v63 = vsel %vm578_vm2, %v1727_v53, %v1728_v12  ;;  %v1307_v2 = vmul.f32 %v2510_v40, %v3195_v24  ;;  %v3334_v21 = vld [vmem:[#allocation2 + $0xf0] sm:$0xff] }
  0xbe   : > { %v1174_v15 = vrot.slane %v1063_v54, 1  ;;  %v618_v51 = vsel %vm578_vm2, %v615_v39, %v617_v13  ;;  %v987_v10 = vmul.f32 %v2529_v48, %v3148_v32  ;;  %v1619_v11 = vmul.f32 %v2492_v31, %v3287_v3 }
  0xbf   : > { %v1574_v42 = vadd.f32 %v1542_v9, %v1506_v18  ;;  %2132 = vst.msk [vmem:[%s2743_s28 + $0x68] sm:$0xff] %vm233_vm0, %v2100_v56  ;;  %v1973_v7 = vsel %vm823_vm3, %v1971_v17, %v1972_v5  ;;  %v706_v26 = vadd.f32 %v618_v51, %v429_v20  ;;  %v1418_v6 = vrot.slane %v1307_v2, 2 }
  0xc0   : > { %v1543_v52 = vmul.f32 %v4085_v34, %v3248_v14  ;;  %v863_v39 = vsel %vm823_vm3, %v860_v41, %v862_v62  ;;  %v1863_v60 = vmul.f32 %v3174_v61, %v3287_v3  ;;  %v506_v23 = vmul.f32 %v2521_v45, %v3142_v43 }
  0xc1   : > { %v1818_v30 = vadd.f32 %v1729_v63, %v1574_v42  ;;  %v951_v8 = vadd.f32 %v863_v39, %v706_v26  ;;  %v1175_v46 = vsel %vm578_vm2, %v1172_v28, %v1174_v15  ;;  %v1730_v16 = vrot.slane %v1619_v11, 1 }
  0xc2   : > { %v3319_v55 = vmul.f32 %v2521_v45, %v3148_v32  ;;  %v430_v4 = vmul.f32 %v2519_v44, %v3142_v43  ;;  %v619_v27 = vrot.slane %v506_v23, 1  ;;  %v751_v41 = vmul.f32 %v2527_v47, %v3142_v43 }
  0xc3   : > { %v2062_v59 = vadd.f32 %v1973_v7, %v1818_v30  ;;  %v1019_v58 = vadd.f32 %v987_v10, %v951_v8  ;;  %v1419_v36 = vsel %vm823_vm3, %v1416_v49, %v1418_v6  ;;  %v3329_v28 = vmul.f32 %v2527_v47, %v3148_v32 }
  0xc4   : > { %v620_v33 = vrot.slane %v3319_v55, 1  ;;  %v1974_v50 = vrot.slane %v1863_v60, 2  ;;  %v864_v57 = vrot.slane %v751_v41, 2  ;;  %v1064_v53 = vmul.f32 %v2500_v35, %v3242_v0  ;;  %v3382_v55 = vld [vmem:[#allocation2 + $0x100] sm:$0x3] }
  0xc5   : > { %v2101_v9 = vadd.f32 %v2731_v25, %v2062_v59  ;;  %v1263_v29 = vadd.f32 %v1175_v46, %v1019_v58  ;;  %v865_v49 = vrot.slane %v3329_v28, 2  ;;  %v1065_v37 = vmul.f32 %v2500_v35, %v3248_v14 }
  0xc6   : > { %v621_v43 = vsel %vm578_vm2, %v619_v27, %v620_v33  ;;  %v988_v1 = vmul.f32 %v2529_v48, %v3242_v0  ;;  %v1308_v17 = vmul.f32 %v2510_v40, %v3242_v0  ;;  %v3350_v54 = vmul.f32 %v2510_v40, %v3248_v14 }
  0xc7   : > { %2133 = vst.msk [vmem:[%s2743_s28 + $0x70] sm:$0xff] %vm233_vm0, %v2101_v9  ;;  %v707_v25 = vadd.f32 %v621_v43, %v430_v4  ;;  %v1507_v18 = vadd.f32 %v1419_v36, %v1263_v29  ;;  %v866_v20 = vsel %vm823_vm3, %v864_v57, %v865_v49  ;;  %v1176_v13 = vrot.slane %v1064_v53, 1 }
  0xc8   : > { %v1177_v62 = vrot.slane %v1065_v37, 1  ;;  %v1420_v63 = vrot.slane %v1308_v17, 2  ;;  %v1421_v15 = vrot.slane %v3350_v54, 2  ;;  %v1620_v2 = vmul.f32 %v2492_v31, %v3334_v21 }
  0xc9   : > { %v952_v56 = vadd.f32 %v866_v20, %v707_v25  ;;  %v1575_v42 = vadd.f32 %v1543_v52, %v1507_v18  ;;  %v1731_v51 = vsel %vm578_vm2, %v1728_v12, %v1730_v16  ;;  %v3361_v10 = vmul.f32 %v2492_v31, %v3340_v22 }
  0xca   : > { %v1864_v11 = vmul.f32 %v3174_v61, %v3334_v21  ;;  %v1975_v7 = vsel %vm823_vm3, %v1972_v5, %v1974_v50  ;;  %v1544_v6 = vmul.f32 %v4085_v34, %v3334_v21  ;;  %v3372_v38 = vmul.f32 %v3174_v61, %v3340_v22 }
  0xcb   : > { %v1020_v26 = vadd.f32 %v988_v1, %v952_v56  ;;  %v1819_v12 = vadd.f32 %v1731_v51, %v1575_v42  ;;  %v1178_v52 = vsel %vm578_vm2, %v1176_v13, %v1177_v62  ;;  %v1732_v30 = vrot.slane %v1620_v2, 1 }
  0xcc   : > { %v1733_v39 = vrot.slane %v3361_v10, 1  ;;  %v1422_v23 = vsel %vm823_vm3, %v1420_v63, %v1421_v15  ;;  %v508_v19 = vmul.f32 %v2521_v45, %v3195_v24  ;;  %v753_v5 = vmul.f32 %v2527_v47, %v3195_v24  ;;  %v3391_v24 = vld [vmem:[%s4063_s2] ss:$0 sm:$0xff] }
  0xcd   : > { %v1264_v60 = vadd.f32 %v1178_v52, %v1020_v26  ;;  %v2063_v8 = vadd.f32 %v1975_v7, %v1819_v12  ;;  %v1976_v46 = vrot.slane %v1864_v11, 2  ;;  %v1977_v16 = vrot.slane %v3372_v38, 2 }
  0xce   : > { %v1066_v59 = vmul.f32 %v2500_v35, %v3287_v3  ;;  %v431_v27 = vmul.f32 %v2519_v44, %v3148_v32  ;;  %v622_v41 = vrot.slane %v508_v19, 1  ;;  %v867_v58 = vrot.slane %v753_v5, 2  ;;  %v3440_v5 = vld [vmem:[#allocation2 + $0x110] sm:$0xff] }
  0xcf   : > { %v1508_v4 = vadd.f32 %v1422_v23, %v1264_v60  ;;  %v2102_v36 = vadd.f32 %v3391_v24, %v2063_v8  ;;  %v1734_v28 = vsel %vm578_vm2, %v1732_v30, %v1733_v39  ;;  %v1310_v50 = vmul.f32 %v2510_v40, %v3287_v3  ;;  %v3434_v60 = vld [vmem:[#allocation2 + $0x108] sm:$0xff] }
  0xd0   : > { %v1179_v9 = vrot.slane %v1066_v59, 1  ;;  %v623_v32 = vsel %vm578_vm2, %v620_v33, %v622_v41  ;;  %v989_v53 = vmul.f32 %v2529_v48, %v3248_v14  ;;  %v1622_v29 = vmul.f32 %v2492_v31, %v3382_v55 }
  0xd1   : > { %v1576_v57 = vadd.f32 %v1544_v6, %v1508_v4  ;;  %2134 = vst.msk [vmem:[%s2743_s28 + $0x78] sm:$0xff] %vm233_vm0, %v2102_v36  ;;  %v1978_v43 = vsel %vm823_vm3, %v1976_v46, %v1977_v16  ;;  %v708_v37 = vadd.f32 %v623_v32, %v431_v27  ;;  %v1423_v25 = vrot.slane %v1310_v50, 2 }
  0xd2   : > { %v1545_v1 = vmul.f32 %v4085_v34, %v3340_v22  ;;  %v868_v33 = vsel %vm823_vm3, %v865_v49, %v867_v58  ;;  %v1866_v54 = vmul.f32 %v3174_v61, %v3382_v55  ;;  %v509_v18 = vmul.f32 %v2521_v45, %v3242_v0 }
  0xd3   : > { %v1820_v17 = vadd.f32 %v1734_v28, %v1576_v57  ;;  %v953_v20 = vadd.f32 %v868_v33, %v708_v37  ;;  %v1180_v13 = vsel %vm578_vm2, %v1177_v62, %v1179_v9  ;;  %v1735_v56 = vrot.slane %v1622_v29, 1 }
  0xd4   : > { %v3419_v63 = vmul.f32 %v2521_v45, %v3248_v14  ;;  %v432_v42 = vmul.f32 %v2519_v44, %v3242_v0  ;;  %v624_v51 = vrot.slane %v509_v18, 1  ;;  %v754_v49 = vmul.f32 %v2527_v47, %v3242_v0 }
  0xd5   : > { %v2064_v2 = vadd.f32 %v1978_v43, %v1820_v17  ;;  %v1021_v11 = vadd.f32 %v989_v53, %v953_v20  ;;  %v1424_v7 = vsel %vm823_vm3, %v1421_v15, %v1423_v25  ;;  %v3429_v62 = vmul.f32 %v2527_v47, %v3248_v14 }
  0xd6   : > { %v625_v26 = vrot.slane %v3419_v63, 1  ;;  %v1979_v12 = vrot.slane %v1866_v54, 2  ;;  %v869_v52 = vrot.slane %v754_v49, 2  ;;  %v1067_v30 = vmul.f32 %v2500_v35, %v3334_v21 }
  0xd7   : > { %v2103_v6 = vadd.f32 %v3391_v24, %v2064_v2  ;;  %v1265_v23 = vadd.f32 %v1180_v13, %v1021_v11  ;;  %v870_v15 = vrot.slane %v3429_v62, 2  ;;  %v1068_v19 = vmul.f32 %v2500_v35, %v3340_v22  ;;  %v3479_v2 = vld [vmem:[#allocation2 + $0x118] sm:$0x3] }
  0xd8   : > { %v626_v0 = vsel %vm578_vm2, %v624_v51, %v625_v26  ;;  %v990_v46 = vmul.f32 %v2529_v48, %v3334_v21  ;;  %v1311_v59 = vmul.f32 %v2510_v40, %v3334_v21  ;;  %v1312_v4 = vmul.f32 %v2510_v40, %v3340_v22 }
  0xd9   : > { %2135 = vst.msk [vmem:[%s2743_s28 + $0x80] sm:$0xff] %vm233_vm0, %v2103_v6  ;;  %v709_v8 = vadd.f32 %v626_v0, %v432_v42  ;;  %v1509_v27 = vadd.f32 %v1424_v7, %v1265_v23  ;;  %v871_v41 = vsel %vm823_vm3, %v869_v52, %v870_v15  ;;  %v1181_v58 = vrot.slane %v1067_v30, 1 }
  0xda   : > { %v1182_v36 = vrot.slane %v1068_v19, 1  ;;  %v1425_v9 = vrot.slane %v1311_v59, 2  ;;  %v1426_v50 = vrot.slane %v1312_v4, 2  ;;  %v1623_v57 = vmul.f32 %v2492_v31, %v3434_v60 }
  0xdb   : > { %v954_v28 = vadd.f32 %v871_v41, %v709_v8  ;;  %v1577_v32 = vadd.f32 %v1545_v1, %v1509_v27  ;;  %v1736_v53 = vsel %vm578_vm2, %v1733_v39, %v1735_v56  ;;  %v3458_v29 = vmul.f32 %v2492_v31, %v3440_v5 }
  0xdc   : > { %v1867_v43 = vmul.f32 %v3174_v61, %v3434_v60  ;;  %v1980_v37 = vsel %vm823_vm3, %v1977_v16, %v1979_v12  ;;  %v1546_v17 = vmul.f32 %v4085_v34, %v3434_v60  ;;  %v3469_v10 = vmul.f32 %v3174_v61, %v3440_v5 }
  0xdd   : > { %v1022_v25 = vadd.f32 %v990_v46, %v954_v28  ;;  %v1821_v39 = vadd.f32 %v1736_v53, %v1577_v32  ;;  %v1183_v1 = vsel %vm578_vm2, %v1181_v58, %v1182_v36  ;;  %v1737_v33 = vrot.slane %v1623_v57, 1 }
  0xde   : > { %v1738_v54 = vrot.slane %v3458_v29, 1  ;;  %v1427_v20 = vsel %vm823_vm3, %v1425_v9, %v1426_v50  ;;  %v511_v38 = vmul.f32 %v2521_v45, %v3287_v3  ;;  %v756_v16 = vmul.f32 %v2527_v47, %v3287_v3 }
  0xdf   : > { %v1266_v18 = vadd.f32 %v1183_v1, %v1022_v25  ;;  %v2065_v13 = vadd.f32 %v1980_v37, %v1821_v39  ;;  %v1981_v56 = vrot.slane %v1867_v43, 2  ;;  %v1982_v63 = vrot.slane %v3469_v10, 2 }
  0xe0   : > { %v1069_v42 = vmul.f32 %v2500_v35, %v3382_v55  ;;  %v433_v49 = vmul.f32 %v2519_v44, %v3248_v14  ;;  %v627_v11 = vrot.slane %v511_v38, 1  ;;  %v872_v7 = vrot.slane %v756_v16, 2  ;;  %v3532_v16 = vld [vmem:[#allocation2 + $0x128] sm:$0xff] }
  0xe1   : > { %v1510_v51 = vadd.f32 %v1427_v20, %v1266_v18  ;;  %v2104_v62 = vadd.f32 %v3391_v24, %v2065_v13  ;;  %v1739_v3 = vsel %vm578_vm2, %v1737_v33, %v1738_v54  ;;  %v1313_v12 = vmul.f32 %v2510_v40, %v3382_v55  ;;  %v3526_v18 = vld [vmem:[#allocation2 + $0x120] sm:$0xff] }
  0xe2   : > { %v1184_v6 = vrot.slane %v1069_v42, 1  ;;  %v628_v30 = vsel %vm578_vm2, %v625_v26, %v627_v11  ;;  %v991_v23 = vmul.f32 %v2529_v48, %v3340_v22  ;;  %v1625_v14 = vmul.f32 %v2492_v31, %v3479_v2 }
  0xe3   : > { %v1578_v52 = vadd.f32 %v1546_v17, %v1510_v51  ;;  %2136 = vst.msk [vmem:[%s2743_s28 + $0x88] sm:$0xff] %vm233_vm0, %v2104_v62  ;;  %v1983_v0 = vsel %vm823_vm3, %v1981_v56, %v1982_v63  ;;  %v710_v19 = vadd.f32 %v628_v30, %v433_v49  ;;  %v1428_v8 = vrot.slane %v1313_v12, 2 }
  0xe4   : > { %v1547_v46 = vmul.f32 %v4085_v34, %v3440_v5  ;;  %v873_v26 = vsel %vm823_vm3, %v870_v15, %v872_v7  ;;  %v1869_v4 = vmul.f32 %v3174_v61, %v3479_v2  ;;  %v512_v27 = vmul.f32 %v2521_v45, %v3334_v21 }
  0xe5   : > { %v1822_v59 = vadd.f32 %v1739_v3, %v1578_v52  ;;  %v955_v41 = vadd.f32 %v873_v26, %v710_v19  ;;  %v1185_v58 = vsel %vm578_vm2, %v1182_v36, %v1184_v6  ;;  %v1740_v28 = vrot.slane %v1625_v14, 1 }
  0xe6   : > { %v3511_v9 = vmul.f32 %v2521_v45, %v3340_v22  ;;  %v434_v32 = vmul.f32 %v2519_v44, %v3334_v21  ;;  %v629_v53 = vrot.slane %v512_v27, 1  ;;  %v757_v15 = vmul.f32 %v2527_v47, %v3334_v21 }
  0xe7   : > { %v2066_v57 = vadd.f32 %v1983_v0, %v1822_v59  ;;  %v1023_v43 = vadd.f32 %v991_v23, %v955_v41  ;;  %v1429_v37 = vsel %vm823_vm3, %v1426_v50, %v1428_v8  ;;  %v3521_v36 = vmul.f32 %v2527_v47, %v3340_v22 }
  0xe8   : > { %v630_v25 = vrot.slane %v3511_v9, 1  ;;  %v1984_v39 = vrot.slane %v1869_v4, 2  ;;  %v874_v1 = vrot.slane %v757_v15, 2  ;;  %v1070_v33 = vmul.f32 %v2500_v35, %v3434_v60 }
  0xe9   : > { %v2105_v17 = vadd.f32 %v3391_v24, %v2066_v57  ;;  %v1267_v20 = vadd.f32 %v1185_v58, %v1023_v43  ;;  %v875_v50 = vrot.slane %v3521_v36, 2  ;;  %v1071_v38 = vmul.f32 %v2500_v35, %v3440_v5  ;;  %v3571_v57 = vld [vmem:[#allocation2 + $0x130] sm:$0x3] }
  0xea   : > { %v631_v21 = vsel %vm578_vm2, %v629_v53, %v630_v25  ;;  %v992_v56 = vmul.f32 %v2529_v48, %v3434_v60  ;;  %v1314_v42 = vmul.f32 %v2510_v40, %v3434_v60  ;;  %v1315_v51 = vmul.f32 %v2510_v40, %v3440_v5 }
  0xeb   : > { %2137 = vst.msk [vmem:[%s2743_s28 + $0x90] sm:$0xff] %vm233_vm0, %v2105_v17  ;;  %v711_v13 = vadd.f32 %v631_v21, %v434_v32  ;;  %v1511_v49 = vadd.f32 %v1429_v37, %v1267_v20  ;;  %v876_v11 = vsel %vm823_vm3, %v874_v1, %v875_v50  ;;  %v1186_v7 = vrot.slane %v1070_v33, 1 }
  0xec   : > { %v1187_v62 = vrot.slane %v1071_v38, 1  ;;  %v1430_v6 = vrot.slane %v1314_v42, 2  ;;  %v1431_v12 = vrot.slane %v1315_v51, 2  ;;  %v1626_v52 = vmul.f32 %v2492_v31, %v3526_v18 }
  0xed   : > { %v956_v3 = vadd.f32 %v876_v11, %v711_v13  ;;  %v1579_v30 = vadd.f32 %v1547_v46, %v1511_v49  ;;  %v1741_v23 = vsel %vm578_vm2, %v1738_v54, %v1740_v28  ;;  %v3550_v14 = vmul.f32 %v2492_v31, %v3532_v16 }
  0xee   : > { %v1870_v0 = vmul.f32 %v3174_v61, %v3526_v18  ;;  %v1985_v19 = vsel %vm823_vm3, %v1982_v63, %v1984_v39  ;;  %v1548_v59 = vmul.f32 %v4085_v34, %v3526_v18  ;;  %v3561_v29 = vmul.f32 %v3174_v61, %v3532_v16 }
  0xef   : > { %v1024_v8 = vadd.f32 %v992_v56, %v956_v3  ;;  %v1823_v54 = vadd.f32 %v1741_v23, %v1579_v30  ;;  %v1188_v46 = vsel %vm578_vm2, %v1186_v7, %v1187_v62  ;;  %v1742_v26 = vrot.slane %v1626_v52, 1 }
  0xf0   : > { %v1743_v4 = vrot.slane %v3550_v14, 1  ;;  %v1432_v41 = vsel %vm823_vm3, %v1430_v6, %v1431_v12  ;;  %v514_v10 = vmul.f32 %v2521_v45, %v3382_v55  ;;  %v759_v63 = vmul.f32 %v2527_v47, %v3382_v55 }
  0xf1   : > { %v1268_v27 = vadd.f32 %v1188_v46, %v1024_v8  ;;  %v2067_v58 = vadd.f32 %v1985_v19, %v1823_v54  ;;  %v1986_v28 = vrot.slane %v1870_v0, 2  ;;  %v1987_v9 = vrot.slane %v3561_v29, 2 }
  0xf2   : > { %v1072_v32 = vmul.f32 %v2500_v35, %v3479_v2  ;;  %v435_v15 = vmul.f32 %v2519_v44, %v3340_v22  ;;  %v632_v43 = vrot.slane %v514_v10, 1  ;;  %v877_v37 = vrot.slane %v759_v63, 2  ;;  %v3624_v63 = vld [vmem:[#allocation2 + $0x140] sm:$0xff] }
  0xf3   : > { %v1512_v53 = vadd.f32 %v1432_v41, %v1268_v27  ;;  %v2106_v36 = vadd.f32 %v3391_v24, %v2067_v58  ;;  %v1744_v55 = vsel %vm578_vm2, %v1742_v26, %v1743_v4  ;;  %v1316_v39 = vmul.f32 %v2510_v40, %v3479_v2  ;;  %v3618_v27 = vld [vmem:[#allocation2 + $0x138] sm:$0xff] }
  0xf4   : > { %v1189_v17 = vrot.slane %v1072_v32, 1  ;;  %v633_v33 = vsel %vm578_vm2, %v630_v25, %v632_v43  ;;  %v993_v20 = vmul.f32 %v2529_v48, %v3440_v5  ;;  %v1628_v22 = vmul.f32 %v2492_v31, %v3571_v57 }
  0xf5   : > { %v1580_v1 = vadd.f32 %v1548_v59, %v1512_v53  ;;  %2138 = vst.msk [vmem:[%s2743_s28 + $0x98] sm:$0xff] %vm233_vm0, %v2106_v36  ;;  %v1988_v21 = vsel %vm823_vm3, %v1986_v28, %v1987_v9  ;;  %v712_v38 = vadd.f32 %v633_v33, %v435_v15  ;;  %v1433_v13 = vrot.slane %v1316_v39, 2 }
  0xf6   : > { %v1549_v56 = vmul.f32 %v4085_v34, %v3532_v16  ;;  %v878_v25 = vsel %vm823_vm3, %v875_v50, %v877_v37  ;;  %v1872_v51 = vmul.f32 %v3174_v61, %v3571_v57  ;;  %v515_v49 = vmul.f32 %v2521_v45, %v3434_v60 }
  0xf7   : > { %v1824_v42 = vadd.f32 %v1744_v55, %v1580_v1  ;;  %v957_v11 = vadd.f32 %v878_v25, %v712_v38  ;;  %v1190_v7 = vsel %vm578_vm2, %v1187_v62, %v1189_v17  ;;  %v1745_v3 = vrot.slane %v1628_v22, 1 }
  0xf8   : > { %v3603_v6 = vmul.f32 %v2521_v45, %v3440_v5  ;;  %v436_v30 = vmul.f32 %v2519_v44, %v3434_v60  ;;  %v634_v23 = vrot.slane %v515_v49, 1  ;;  %v760_v50 = vmul.f32 %v2527_v47, %v3434_v60 }
  0xf9   : > { %v2068_v52 = vadd.f32 %v1988_v21, %v1824_v42  ;;  %v1025_v0 = vadd.f32 %v993_v20, %v957_v11  ;;  %v1434_v19 = vsel %vm823_vm3, %v1431_v12, %v1433_v13  ;;  %v3613_v62 = vmul.f32 %v2527_v47, %v3440_v5 }
  0xfa   : > { %v635_v8 = vrot.slane %v3603_v6, 1  ;;  %v1989_v54 = vrot.slane %v1872_v51, 2  ;;  %v879_v46 = vrot.slane %v760_v50, 2  ;;  %v1073_v26 = vmul.f32 %v2500_v35, %v3526_v18 }
  0xfb   : > { %v2107_v59 = vadd.f32 %v3391_v24, %v2068_v52  ;;  %v1269_v41 = vadd.f32 %v1190_v7, %v1025_v0  ;;  %v880_v12 = vrot.slane %v3613_v62, 2  ;;  %v1074_v10 = vmul.f32 %v2500_v35, %v3532_v16  ;;  %v3663_v52 = vld [vmem:[#allocation2 + $0x148] sm:$0x3] }
  0xfc   : > { %v636_v60 = vsel %vm578_vm2, %v634_v23, %v635_v8  ;;  %v994_v28 = vmul.f32 %v2529_v48, %v3526_v18  ;;  %v1317_v32 = vmul.f32 %v2510_v40, %v3526_v18  ;;  %v1318_v53 = vmul.f32 %v2510_v40, %v3532_v16 }
  0xfd   : > { %2139 = vst.msk [vmem:[%s2743_s28 + $0xa0] sm:$0xff] %vm233_vm0, %v2107_v59  ;;  %v713_v58 = vadd.f32 %v636_v60, %v436_v30  ;;  %v1513_v15 = vadd.f32 %v1434_v19, %v1269_v41  ;;  %v881_v43 = vsel %vm823_vm3, %v879_v46, %v880_v12  ;;  %v1191_v37 = vrot.slane %v1073_v26, 1 }
  0xfe   : > { %v1192_v36 = vrot.slane %v1074_v10, 1  ;;  %v1435_v17 = vrot.slane %v1317_v32, 2  ;;  %v1436_v39 = vrot.slane %v1318_v53, 2  ;;  %v1629_v1 = vmul.f32 %v2492_v31, %v3618_v27 }
  0xff   : > { %v958_v55 = vadd.f32 %v881_v43, %v713_v58  ;;  %v1581_v33 = vadd.f32 %v1549_v56, %v1513_v15  ;;  %v1746_v20 = vsel %vm578_vm2, %v1743_v4, %v1745_v3  ;;  %v3642_v22 = vmul.f32 %v2492_v31, %v3624_v63 }
 0x100   : > { %v1873_v21 = vmul.f32 %v3174_v61, %v3618_v27  ;;  %v1990_v38 = vsel %vm823_vm3, %v1987_v9, %v1989_v54  ;;  %v1550_v42 = vmul.f32 %v4085_v34, %v3618_v27  ;;  %v3653_v14 = vmul.f32 %v3174_v61, %v3624_v63 }
 0x101   : > { %v1026_v13 = vadd.f32 %v994_v28, %v958_v55  ;;  %v1825_v4 = vadd.f32 %v1746_v20, %v1581_v33  ;;  %v1193_v56 = vsel %vm578_vm2, %v1191_v37, %v1192_v36  ;;  %v1747_v25 = vrot.slane %v1629_v1, 1 }
 0x102   : > { %v1748_v51 = vrot.slane %v3642_v22, 1  ;;  %v1437_v11 = vsel %vm823_vm3, %v1435_v17, %v1436_v39  ;;  %v517_v29 = vmul.f32 %v2521_v45, %v3479_v2  ;;  %v762_v9 = vmul.f32 %v2527_v47, %v3479_v2 }
 0x103   : > { %v1270_v49 = vadd.f32 %v1193_v56, %v1026_v13  ;;  %v2069_v7 = vadd.f32 %v1990_v38, %v1825_v4  ;;  %v1991_v3 = vrot.slane %v1873_v21, 2  ;;  %v1992_v6 = vrot.slane %v3653_v14, 2 }
 0x104   : > { %v1075_v30 = vmul.f32 %v2500_v35, %v3571_v57  ;;  %v437_v50 = vmul.f32 %v2519_v44, %v3440_v5  ;;  %v637_v0 = vrot.slane %v517_v29, 1  ;;  %v882_v19 = vrot.slane %v762_v9, 2  ;;  %v3716_v9 = vld [vmem:[#allocation2 + $0x158] sm:$0xff] }
 0x105   : > { %v1514_v23 = vadd.f32 %v1437_v11, %v1270_v49  ;;  %v2108_v62 = vadd.f32 %v3391_v24, %v2069_v7  ;;  %v1749_v2 = vsel %vm578_vm2, %v1747_v25, %v1748_v51  ;;  %v1319_v54 = vmul.f32 %v2510_v40, %v3571_v57  ;;  %v3710_v49 = vld [vmem:[#allocation2 + $0x150] sm:$0xff] }
 0x106   : > { %v1194_v59 = vrot.slane %v1075_v30, 1  ;;  %v638_v26 = vsel %vm578_vm2, %v635_v8, %v637_v0  ;;  %v995_v41 = vmul.f32 %v2529_v48, %v3532_v16  ;;  %v1631_v5 = vmul.f32 %v2492_v31, %v3663_v52 }
 0x107   : > { %v1582_v46 = vadd.f32 %v1550_v42, %v1514_v23  ;;  %2140 = vst.msk [vmem:[%s2743_s28 + $0xa8] sm:$0xff] %vm233_vm0, %v2108_v62  ;;  %v1993_v60 = vsel %vm823_vm3, %v1991_v3, %v1992_v6  ;;  %v714_v10 = vadd.f32 %v638_v26, %v437_v50  ;;  %v1438_v58 = vrot.slane %v1319_v54, 2 }
 0x108   : > { %v1551_v28 = vmul.f32 %v4085_v34, %v3624_v63  ;;  %v883_v8 = vsel %vm823_vm3, %v880_v12, %v882_v19  ;;  %v1875_v53 = vmul.f32 %v3174_v61, %v3663_v52  ;;  %v518_v15 = vmul.f32 %v2521_v45, %v3526_v18 }
 0x109   : > { %v1826_v32 = vadd.f32 %v1749_v2, %v1582_v46  ;;  %v959_v43 = vadd.f32 %v883_v8, %v714_v10  ;;  %v1195_v37 = vsel %vm578_vm2, %v1192_v36, %v1194_v59  ;;  %v1750_v55 = vrot.slane %v1631_v5, 1 }
 0x10a   : > { %v3695_v17 = vmul.f32 %v2521_v45, %v3532_v16  ;;  %v438_v33 = vmul.f32 %v2519_v44, %v3526_v18  ;;  %v639_v20 = vrot.slane %v518_v15, 1  ;;  %v763_v12 = vmul.f32 %v2527_v47, %v3526_v18 }
 0x10b   : > { %v2070_v1 = vadd.f32 %v1993_v60, %v1826_v32  ;;  %v1027_v21 = vadd.f32 %v995_v41, %v959_v43  ;;  %v1439_v38 = vsel %vm823_vm3, %v1436_v39, %v1438_v58  ;;  %v3705_v36 = vmul.f32 %v2527_v47, %v3532_v16 }
 0x10c   : > { %v640_v13 = vrot.slane %v3695_v17, 1  ;;  %v1994_v4 = vrot.slane %v1875_v53, 2  ;;  %v884_v56 = vrot.slane %v763_v12, 2  ;;  %v1076_v25 = vmul.f32 %v2500_v35, %v3618_v27 }
 0x10d   : > { %v2109_v42 = vadd.f32 %v3391_v24, %v2070_v1  ;;  %v1271_v11 = vadd.f32 %v1195_v37, %v1027_v21  ;;  %v885_v39 = vrot.slane %v3705_v36, 2  ;;  %v1077_v29 = vmul.f32 %v2500_v35, %v3624_v63  ;;  %v3755_v1 = vld [vmem:[#allocation2 + $0x160] sm:$0x3] }
 0x10e   : > { %v641_v18 = vsel %vm578_vm2, %v639_v20, %v640_v13  ;;  %v996_v3 = vmul.f32 %v2529_v48, %v3618_v27  ;;  %v1320_v30 = vmul.f32 %v2510_v40, %v3618_v27  ;;  %v1321_v23 = vmul.f32 %v2510_v40, %v3624_v63 }
 0x10f   : > { %2141 = vst.msk [vmem:[%s2743_s28 + $0xb0] sm:$0xff] %vm233_vm0, %v2109_v42  ;;  %v715_v7 = vadd.f32 %v641_v18, %v438_v33  ;;  %v1515_v50 = vadd.f32 %v1439_v38, %v1271_v11  ;;  %v886_v0 = vsel %vm823_vm3, %v884_v56, %v885_v39  ;;  %v1196_v19 = vrot.slane %v1076_v25, 1 }
 0x110   : > { %v1197_v62 = vrot.slane %v1077_v29, 1  ;;  %v1440_v59 = vrot.slane %v1320_v30, 2  ;;  %v1441_v54 = vrot.slane %v1321_v23, 2  ;;  %v1632_v46 = vmul.f32 %v2492_v31, %v3710_v49 }
 0x111   : > { %v960_v2 = vadd.f32 %v886_v0, %v715_v7  ;;  %v1583_v26 = vadd.f32 %v1551_v28, %v1515_v50  ;;  %v1751_v41 = vsel %vm578_vm2, %v1748_v51, %v1750_v55  ;;  %v3734_v5 = vmul.f32 %v2492_v31, %v3716_v9 }
 0x112   : > { %v1876_v60 = vmul.f32 %v3174_v61, %v3710_v49  ;;  %v1995_v10 = vsel %vm823_vm3, %v1992_v6, %v1994_v4  ;;  %v1552_v32 = vmul.f32 %v4085_v34, %v3710_v49  ;;  %v3745_v22 = vmul.f32 %v3174_v61, %v3716_v9 }
 0x113   : > { %v1028_v58 = vadd.f32 %v996_v3, %v960_v2  ;;  %v1827_v51 = vadd.f32 %v1751_v41, %v1583_v26  ;;  %v1198_v28 = vsel %vm578_vm2, %v1196_v19, %v1197_v62  ;;  %v1752_v8 = vrot.slane %v1632_v46, 1 }
 0x114   : > { %v1753_v53 = vrot.slane %v3734_v5, 1  ;;  %v1442_v43 = vsel %vm823_vm3, %v1440_v59, %v1441_v54  ;;  %v520_v14 = vmul.f32 %v2521_v45, %v3571_v57  ;;  %v765_v6 = vmul.f32 %v2527_v47, %v3571_v57 }
 0x115   : > { %v1272_v15 = vadd.f32 %v1198_v28, %v1028_v58  ;;  %v2071_v37 = vadd.f32 %v1995_v10, %v1827_v51  ;;  %v1996_v55 = vrot.slane %v1876_v60, 2  ;;  %v1997_v17 = vrot.slane %v3745_v22, 2 }
 0x116   : > { %v1078_v33 = vmul.f32 %v2500_v35, %v3663_v52  ;;  %v439_v12 = vmul.f32 %v2519_v44, %v3532_v16  ;;  %v642_v21 = vrot.slane %v520_v14, 1  ;;  %v887_v38 = vrot.slane %v765_v6, 2  ;;  %v3808_v14 = vld [vmem:[#allocation2 + $0x170] sm:$0xff] }
 0x117   : > { %v1516_v20 = vadd.f32 %v1442_v43, %v1272_v15  ;;  %v2110_v36 = vadd.f32 %v3391_v24, %v2071_v37  ;;  %v1754_v57 = vsel %vm578_vm2, %v1752_v8, %v1753_v53  ;;  %v1322_v4 = vmul.f32 %v2510_v40, %v3663_v52  ;;  %v3802_v8 = vld [vmem:[#allocation2 + $0x168] sm:$0xff] }
 0x118   : > { %v1199_v42 = vrot.slane %v1078_v33, 1  ;;  %v643_v25 = vsel %vm578_vm2, %v640_v13, %v642_v21  ;;  %v997_v11 = vmul.f32 %v2529_v48, %v3624_v63  ;;  %v1634_v16 = vmul.f32 %v2492_v31, %v3755_v1 }
 0x119   : > { %v1584_v56 = vadd.f32 %v1552_v32, %v1516_v20  ;;  %2142 = vst.msk [vmem:[%s2743_s28 + $0xb8] sm:$0xff] %vm233_vm0, %v2110_v36  ;;  %v1998_v18 = vsel %vm823_vm3, %v1996_v55, %v1997_v17  ;;  %v716_v29 = vadd.f32 %v643_v25, %v439_v12  ;;  %v1443_v7 = vrot.slane %v1322_v4, 2 }
 0x11a   : > { %v1553_v3 = vmul.f32 %v4085_v34, %v3716_v9  ;;  %v888_v13 = vsel %vm823_vm3, %v885_v39, %v887_v38  ;;  %v1878_v23 = vmul.f32 %v3174_v61, %v3755_v1  ;;  %v521_v50 = vmul.f32 %v2521_v45, %v3618_v27 }
 0x11b   : > { %v1828_v30 = vadd.f32 %v1754_v57, %v1584_v56  ;;  %v961_v0 = vadd.f32 %v888_v13, %v716_v29  ;;  %v1200_v19 = vsel %vm578_vm2, %v1197_v62, %v1199_v42  ;;  %v1755_v2 = vrot.slane %v1634_v16, 1  ;;  %v3834_v16 = vld [vmem:[%s4062_s1 + $0x8] ss:$0 sm:$0xff] }
 0x11c   : > { %v3787_v59 = vmul.f32 %v2521_v45, %v3624_v63  ;;  %v440_v26 = vmul.f32 %v2519_v44, %v3618_v27  ;;  %v644_v41 = vrot.slane %v521_v50, 1  ;;  %v766_v61 = vmul.f32 %v2527_v47, %v3618_v27 }
 0x11d   : > { %v2072_v46 = vadd.f32 %v1998_v18, %v1828_v30  ;;  %v1029_v39 = vadd.f32 %v997_v11, %v961_v0  ;;  %v1444_v60 = vsel %vm823_vm3, %v1441_v54, %v1443_v7  ;;  %v3797_v62 = vmul.f32 %v2527_v47, %v3624_v63 }
 0x11e   : > { %v645_v10 = vrot.slane %v3787_v59, 1  ;;  %v1999_v32 = vrot.slane %v1878_v23, 2  ;;  %v889_v51 = vrot.slane %v766_v61, 2  ;;  %v1079_v28 = vmul.f32 %v2500_v35, %v3710_v49 }
 0x11f   : > { %v2111_v58 = vadd.f32 %v3391_v24, %v2072_v46  ;;  %v1273_v15 = vadd.f32 %v1200_v19, %v1029_v39  ;;  %v890_v54 = vrot.slane %v3797_v62, 2  ;;  %v1080_v43 = vmul.f32 %v2500_v35, %v3716_v9  ;;  %v3855_v46 = vld [vmem:[#allocation2 + $0x178] sm:$0x3] }
 0x120   : > { %v646_v27 = vsel %vm578_vm2, %v644_v41, %v645_v10  ;;  %v998_v37 = vmul.f32 %v2529_v48, %v3710_v49  ;;  %v1323_v55 = vmul.f32 %v2510_v40, %v3710_v49  ;;  %v3818_v33 = vmul.f32 %v2510_v40, %v3716_v9 }
 0x121   : > { %2143 = vst.msk [vmem:[%s2743_s28 + $0xc0] sm:$0xff] %vm233_vm0, %v2111_v58  ;;  %v717_v6 = vadd.f32 %v646_v27, %v440_v26  ;;  %v1517_v20 = vadd.f32 %v1444_v60, %v1273_v15  ;;  %v891_v12 = vsel %vm823_vm3, %v889_v51, %v890_v54  ;;  %v1201_v21 = vrot.slane %v1079_v28, 1 }
 0x122   : > { %v1202_v38 = vrot.slane %v1080_v43, 1  ;;  %v1445_v57 = vrot.slane %v1323_v55, 2  ;;  %v1446_v42 = vrot.slane %v3818_v33, 2  ;;  %v1635_v4 = vmul.f32 %v2492_v31, %v3802_v8 }
 0x123   : > { %v962_v36 = vadd.f32 %v891_v12, %v717_v6  ;;  %v1585_v56 = vadd.f32 %v1553_v3, %v1517_v20  ;;  %v1756_v25 = vsel %vm578_vm2, %v1753_v53, %v1755_v2  ;;  %v3829_v11 = vmul.f32 %v2492_v31, %v3808_v14 }
 0x124   : > { %v1879_v18 = vmul.f32 %v3834_v16, %v3802_v8  ;;  %v2000_v29 = vsel %vm823_vm3, %v1997_v17, %v1999_v32  ;;  %v1554_v5 = vmul.f32 %v4085_v34, %v3802_v8  ;;  %v3845_v53 = vmul.f32 %v3834_v16, %v3808_v14 }
 0x125   : > { %v1030_v7 = vadd.f32 %v998_v37, %v962_v36  ;;  %v1829_v3 = vadd.f32 %v1756_v25, %v1585_v56  ;;  %v1203_v30 = vsel %vm578_vm2, %v1201_v21, %v1202_v38  ;;  %v1757_v13 = vrot.slane %v1635_v4, 1 }
 0x126   : > { %v1758_v23 = vrot.slane %v3829_v11, 1  ;;  %v1447_v0 = vsel %vm823_vm3, %v1445_v57, %v1446_v42  ;;  %v523_v22 = vmul.f32 %v2521_v45, %v3663_v52  ;;  %v768_v17 = vmul.f32 %v2527_v47, %v3663_v52 }
 0x127   : > { %v1274_v50 = vadd.f32 %v1203_v30, %v1030_v7  ;;  %v2073_v19 = vadd.f32 %v2000_v29, %v1829_v3  ;;  %v2001_v2 = vrot.slane %v1879_v18, 2  ;;  %v2002_v59 = vrot.slane %v3845_v53, 2 }
 0x128   : > { %v1081_v26 = vmul.f32 %v2500_v35, %v3755_v1  ;;  %v441_v61 = vmul.f32 %v2519_v44, %v3624_v63  ;;  %v647_v39 = vrot.slane %v523_v22, 1  ;;  %v892_v60 = vrot.slane %v768_v17, 2  ;;  %v3910_v17 = vld [vmem:[#allocation2 + $0x188] sm:$0xff] }
 0x129   : > { %v1518_v41 = vadd.f32 %v1447_v0, %v1274_v50  ;;  %v2112_v62 = vadd.f32 %v3391_v24, %v2073_v19  ;;  %v1759_v52 = vsel %vm578_vm2, %v1757_v13, %v1758_v23  ;;  %v1325_v32 = vmul.f32 %v2510_v40, %v3755_v1  ;;  %v3902_v0 = vld [vmem:[#allocation2 + $0x180] sm:$0xff] }
 0x12a   : > { %v1204_v58 = vrot.slane %v1081_v26, 1  ;;  %v648_v28 = vsel %vm578_vm2, %v645_v10, %v647_v39  ;;  %v999_v15 = vmul.f32 %v2529_v48, %v3716_v9  ;;  %v1637_v63 = vmul.f32 %v2492_v31, %v3855_v46 }
 0x12b   : > { %v1586_v51 = vadd.f32 %v1554_v5, %v1518_v41  ;;  %2144 = vst.msk [vmem:[%s2743_s28 + $0xc8] sm:$0xff] %vm233_vm0, %v2112_v62  ;;  %v2003_v27 = vsel %vm823_vm3, %v2001_v2, %v2002_v59  ;;  %v718_v43 = vadd.f32 %v648_v28, %v441_v61  ;;  %v1448_v6 = vrot.slane %v1325_v32, 2 }
 0x12c   : > { %v1555_v37 = vmul.f32 %v4085_v34, %v3808_v14  ;;  %v893_v10 = vsel %vm823_vm3, %v890_v54, %v892_v60  ;;  %v1881_v33 = vmul.f32 %v3834_v16, %v3855_v46  ;;  %v524_v20 = vmul.f32 %v2521_v45, %v3710_v49 }
 0x12d   : > { %v1830_v55 = vadd.f32 %v1759_v52, %v1586_v51  ;;  %v963_v12 = vadd.f32 %v893_v10, %v718_v43  ;;  %v1205_v21 = vsel %vm578_vm2, %v1202_v38, %v1204_v58  ;;  %v1760_v36 = vrot.slane %v1637_v63, 1 }
 0x12e   : > { %v3887_v57 = vmul.f32 %v2521_v45, %v3716_v9  ;;  %v442_v56 = vmul.f32 %v2519_v44, %v3710_v49  ;;  %v649_v54 = vrot.slane %v524_v20, 1  ;;  %v769_v25 = vmul.f32 %v2527_v47, %v3710_v49 }
 0x12f   : > { %v2074_v4 = vadd.f32 %v2003_v27, %v1830_v55  ;;  %v1031_v18 = vadd.f32 %v999_v15, %v963_v12  ;;  %v1449_v29 = vsel %vm823_vm3, %v1446_v42, %v1448_v6  ;;  %v3897_v38 = vmul.f32 %v2527_v47, %v3716_v9 }
 0x130   : > { %v650_v7 = vrot.slane %v3887_v57, 1  ;;  %v2004_v3 = vrot.slane %v1881_v33, 2  ;;  %v894_v30 = vrot.slane %v769_v25, 2  ;;  %v1082_v13 = vmul.f32 %v2500_v35, %v3802_v8  ;;  %v3945_v57 = vld [vmem:[#allocation2 + $0x190] sm:$0x3] }
 0x131   : > { %v2113_v5 = vadd.f32 %v3391_v24, %v2074_v4  ;;  %v1275_v50 = vadd.f32 %v1205_v21, %v1031_v18  ;;  %v895_v42 = vrot.slane %v3897_v38, 2  ;;  %v1083_v22 = vmul.f32 %v2500_v35, %v3808_v14 }
 0x132   : > { %v651_v49 = vsel %vm578_vm2, %v649_v54, %v650_v7  ;;  %v1000_v2 = vmul.f32 %v2529_v48, %v3802_v8  ;;  %v1326_v26 = vmul.f32 %v2510_v40, %v3802_v8  ;;  %v1327_v41 = vmul.f32 %v2510_v40, %v3808_v14 }
 0x133   : > { %2145 = vst.msk [vmem:[%s2743_s28 + $0xd0] sm:$0xff] %vm233_vm0, %v2113_v5  ;;  %v719_v19 = vadd.f32 %v651_v49, %v442_v56  ;;  %v1519_v61 = vadd.f32 %v1449_v29, %v1275_v50  ;;  %v896_v39 = vsel %vm823_vm3, %v894_v30, %v895_v42  ;;  %v1206_v60 = vrot.slane %v1082_v13, 1 }
 0x134   : > { %v1207_v62 = vrot.slane %v1083_v22, 1  ;;  %v1450_v58 = vrot.slane %v1326_v26, 2  ;;  %v1451_v32 = vrot.slane %v1327_v41, 2  ;;  %v1638_v51 = vmul.f32 %v2492_v31, %v3902_v0 }
 0x135   : > { %v964_v52 = vadd.f32 %v896_v39, %v719_v19  ;;  %v1587_v28 = vadd.f32 %v1555_v37, %v1519_v61  ;;  %v3923_v15 = vmul.f32 %v2492_v31, %v3910_v17  ;;  %v1882_v63 = vmul.f32 %v3834_v16, %v3902_v0 }
 0x136   : > { %v1761_v27 = vsel %vm578_vm2, %v1758_v23, %v1760_v36  ;;  %v2005_v43 = vsel %vm823_vm3, %v2002_v59, %v2004_v3  ;;  %v3935_v55 = vmul.f32 %v3834_v16, %v3910_v17  ;;  %v1208_v10 = vsel %vm578_vm2, %v1206_v60, %v1207_v62 }
 0x137   : > { %v1032_v6 = vadd.f32 %v1000_v2, %v964_v52  ;;  %v1831_v37 = vadd.f32 %v1761_v27, %v1587_v28  ;;  %v1452_v33 = vsel %vm823_vm3, %v1450_v58, %v1451_v32  ;;  %v1762_v20 = vrot.slane %v1638_v51, 1 }
 0x138   : > { %v1763_v11 = vrot.slane %v3923_v15, 1  ;;  %v526_v23 = vmul.f32 %v2521_v45, %v3755_v1  ;;  %v771_v53 = vmul.f32 %v2527_v47, %v3755_v1  ;;  %v2006_v21 = vrot.slane %v1882_v63, 2 }
 0x139   : > { %v1276_v12 = vadd.f32 %v1208_v10, %v1032_v6  ;;  %v2075_v59 = vadd.f32 %v2005_v43, %v1831_v37  ;;  %v2007_v36 = vrot.slane %v3935_v55, 2  ;;  %v1084_v4 = vmul.f32 %v2500_v35, %v3855_v46 }
 0x13a   : > { %v1556_v54 = vmul.f32 %v4085_v34, %v3902_v0  ;;  %v652_v25 = vrot.slane %v526_v23, 1  ;;  %v897_v18 = vrot.slane %v771_v53, 2  ;;  %v443_v1 = vmul.f32 %v2519_v44, %v3716_v9  ;;  %v406_v53 = vld [vmem:[#allocation2 + $0x1a0] sm:$0xff] }
 0x13b   : > { %v1520_v56 = vadd.f32 %v1452_v33, %v1276_v12  ;;  %v2114_v29 = vadd.f32 %v3391_v24, %v2075_v59  ;;  %v1209_v38 = vrot.slane %v1084_v4, 1  ;;  %v1328_v5 = vmul.f32 %v2510_v40, %v3855_v46  ;;  %v405_v12 = vld [vmem:[#allocation2 + $0x198] sm:$0xff] }
 0x13c   : > { %v1764_v30 = vsel %vm578_vm2, %v1762_v20, %v1763_v11  ;;  %v653_v13 = vsel %vm578_vm2, %v650_v7, %v652_v25  ;;  %v1640_v50 = vmul.f32 %v2492_v31, %v3945_v57  ;;  %v2008_v9 = vsel %vm823_vm3, %v2006_v21, %v2007_v36 }
 0x13d   : > { %v1588_v3 = vadd.f32 %v1556_v54, %v1520_v56  ;;  %2146 = vst.msk [vmem:[%s2743_s28 + $0xd8] sm:$0xff] %vm233_vm0, %v2114_v29  ;;  %v720_v49 = vadd.f32 %v653_v13, %v443_v1  ;;  %v1001_v22 = vmul.f32 %v2529_v48, %v3808_v14  ;;  %v1453_v19 = vrot.slane %v1328_v5, 2 }
 0x13e   : > { %v898_v26 = vsel %vm823_vm3, %v895_v42, %v897_v18  ;;  %v1884_v7 = vmul.f32 %v3834_v16, %v3945_v57  ;;  %v527_v41 = vmul.f32 %v2521_v45, %v3802_v8  ;;  %v1210_v39 = vsel %vm578_vm2, %v1207_v62, %v1209_v38 }
 0x13f   : > { %v1832_v2 = vadd.f32 %v1764_v30, %v1588_v3  ;;  %v965_v61 = vadd.f32 %v898_v26, %v720_v49  ;;  %v1765_v60 = vrot.slane %v1640_v50, 1  ;;  %v3977_v52 = vmul.f32 %v2521_v45, %v3808_v14 }
 0x140   : > { %v444_v51 = vmul.f32 %v2519_v44, %v3802_v8  ;;  %v654_v42 = vrot.slane %v527_v41, 1  ;;  %v772_v28 = vmul.f32 %v2527_v47, %v3802_v8  ;;  %v1454_v27 = vsel %vm823_vm3, %v1451_v32, %v1453_v19 }
 0x141   : > { %v2076_v58 = vadd.f32 %v2008_v9, %v1832_v2  ;;  %v1033_v63 = vadd.f32 %v1001_v22, %v965_v61  ;;  %v655_v43 = vrot.slane %v3977_v52, 1  ;;  %v3987_v62 = vmul.f32 %v2527_v47, %v3808_v14 }
 0x142   : > { %v2009_v37 = vrot.slane %v1884_v7, 2  ;;  %v899_v10 = vrot.slane %v772_v28, 2  ;;  %v1085_v33 = vmul.f32 %v2500_v35, %v3902_v0  ;;  %v1086_v32 = vmul.f32 %v2500_v35, %v3910_v17 }
 0x143   : > { %v2115_v6 = vadd.f32 %v3391_v24, %v2076_v58  ;;  %v1277_v20 = vadd.f32 %v1210_v39, %v1033_v63  ;;  %v656_v8 = vsel %vm578_vm2, %v654_v42, %v655_v43  ;;  %v900_v23 = vrot.slane %v3987_v62, 2  ;;  %v2307_v42 = vld [vmem:[%s4063_s2] ss:$0 sm:$0xff] }
 0x144   : > { %v721_v59 = vadd.f32 %v656_v8, %v444_v51  ;;  %v1211_v21 = vrot.slane %v1085_v33, 1  ;;  %v1329_v24 = vmul.f32 %v2510_v40, %v3902_v0  ;;  %v1330_v4 = vmul.f32 %v2510_v40, %v3910_v17 }
 0x145   : > { %2147 = vst.msk [vmem:[%s2743_s28 + $0xe0] sm:$0xff] %vm233_vm0, %v2115_v6  ;;  %v1521_v56 = vadd.f32 %v1454_v27, %v1277_v20  ;;  %v1557_v54 = vmul.f32 %v4085_v34, %v3910_v17  ;;  %v901_v25 = vsel %vm823_vm3, %v899_v10, %v900_v23  ;;  %v1212_v18 = vrot.slane %v1086_v32, 1 }
 0x146   : > { %v966_v29 = vadd.f32 %v901_v25, %v721_v59  ;;  %v1002_v1 = vmul.f32 %v2529_v48, %v3902_v0  ;;  %v1455_v38 = vrot.slane %v1329_v24, 2  ;;  %v1641_v5 = vmul.f32 %v2492_v31, %v405_v12 }
 0x147   : > { %v1589_v3 = vadd.f32 %v1557_v54, %v1521_v56  ;;  %v1213_v30 = vsel %vm578_vm2, %v1211_v21, %v1212_v18  ;;  %v1456_v13 = vrot.slane %v1330_v4, 2  ;;  %v1642_v50 = vmul.f32 %v2492_v31, %v406_v53 }
 0x148   : > { %v1766_v9 = vsel %vm578_vm2, %v1763_v11, %v1765_v60  ;;  %v2010_v49 = vsel %vm823_vm3, %v2007_v36, %v2009_v37  ;;  %v1034_v22 = vadd.f32 %v1002_v1, %v966_v29  ;;  %v1885_v0 = vmul.f32 %v3834_v16, %v405_v12 }
 0x149   : > { %v1833_v19 = vadd.f32 %v1766_v9, %v1589_v3  ;;  %v1767_v2 = vrot.slane %v1641_v5, 1  ;;  %v1768_v26 = vrot.slane %v1642_v50, 1  ;;  %v1886_v7 = vmul.f32 %v3834_v16, %v406_v53 }
 0x14a   : > { %v1278_v41 = vadd.f32 %v1213_v30, %v1034_v22  ;;  %v1558_v61 = vmul.f32 %v4085_v34, %v405_v12  ;;  %v529_v15 = vmul.f32 %v2521_v45, %v3855_v46  ;;  %v774_v11 = vmul.f32 %v2527_v47, %v3855_v46  ;;  %v407_v47 = vld [vmem:[#allocation2 + $0x1a8] sm:$0x3] }
 0x14b   : > { %v2077_v55 = vadd.f32 %v2010_v49, %v1833_v19  ;;  %v1457_v36 = vsel %vm823_vm3, %v1455_v38, %v1456_v13  ;;  %v1087_v39 = vmul.f32 %v2500_v35, %v3945_v57  ;;  %v2011_v52 = vrot.slane %v1885_v0, 2 }
 0x14c   : > { %v1522_v60 = vadd.f32 %v1457_v36, %v1278_v41  ;;  %v657_v58 = vrot.slane %v529_v15, 1  ;;  %v902_v51 = vrot.slane %v774_v11, 2  ;;  %v1769_v45 = vsel %vm578_vm2, %v1767_v2, %v1768_v26 }
 0x14d   : > { %v2116_v28 = vadd.f32 %v2307_v42, %v2077_v55  ;;  %v2012_v63 = vrot.slane %v1886_v7, 2  ;;  %v445_v46 = vmul.f32 %v2519_v44, %v3808_v14  ;;  %v1214_v35 = vrot.slane %v1087_v39, 1 }
 0x14e   : > { %v1590_v27 = vadd.f32 %v1558_v61, %v1522_v60  ;;  %v658_v62 = vsel %vm578_vm2, %v655_v43, %v657_v58  ;;  %v1331_v6 = vmul.f32 %v2510_v40, %v3945_v57  ;;  %v1003_v10 = vmul.f32 %v2529_v48, %v3910_v17 }
 0x14f   : > { %2148 = vst.msk [vmem:[%s2743_s28 + $0xe8] sm:$0xff] %vm233_vm0, %v2116_v28  ;;  %v722_v37 = vadd.f32 %v658_v62, %v445_v46  ;;  %v903_v20 = vsel %vm823_vm3, %v900_v23, %v902_v51  ;;  %v1643_v12 = vmul.f32 %v2492_v31, %v407_v47  ;;  %v2013_v44 = vsel %vm823_vm3, %v2011_v52, %v2012_v63 }
 0x150   : > { %v1834_v33 = vadd.f32 %v1769_v45, %v1590_v27  ;;  %v1215_v8 = vsel %vm578_vm2, %v1212_v18, %v1214_v35  ;;  %v1458_v32 = vrot.slane %v1331_v6, 2  ;;  %v1887_v21 = vmul.f32 %v3834_v16, %v407_v47 }
 0x151   : > { %v967_v14 = vadd.f32 %v903_v20, %v722_v37  ;;  %v1770_v59 = vrot.slane %v1643_v12, 1  ;;  %v1559_v48 = vmul.f32 %v4085_v34, %v406_v53 }
 0x152   : > { %v2078_v43 = vadd.f32 %v2013_v44, %v1834_v33  ;;  %v1459_v31 = vsel %vm823_vm3, %v1456_v13, %v1458_v32  ;;  %v2014_v4 = vrot.slane %v1887_v21, 2 }
 0x153   : > { %v1035_v40 = vadd.f32 %v1003_v10, %v967_v14  ;;  %v1771_v23 = vsel %vm578_vm2, %v1768_v26, %v1770_v59 }
 0x154   : > { %v2117_v57 = vadd.f32 %v2307_v42, %v2078_v43  ;;  %v2015_v25 = vsel %vm823_vm3, %v2012_v63, %v2014_v4 }
 0x155   : > { %v1279_v24 = vadd.f32 %v1215_v8, %v1035_v40 }
 0x156   : > { %2149 = vst.msk [vmem:[%s2743_s28 + $0xf0] sm:$0xff] %vm233_vm0, %v2117_v57 }
 0x157   : > { %v1523_v17 = vadd.f32 %v1459_v31, %v1279_v24 }
 0x159   : > { %v1591_v56 = vadd.f32 %v1559_v48, %v1523_v17 }
 0x15b   : > { %v1835_v54 = vadd.f32 %v1771_v23, %v1591_v56 }
 0x15d   : > { %v2079_v18 = vadd.f32 %v2015_v25, %v1835_v54 }
 0x15f   : > { %v2118_v29 = vadd.f32 %v2307_v42, %v2079_v18 }
 0x161   : > { %2150 = vst.msk [vmem:[%s2743_s28 + $0xf8] sm:$0xff] %vm233_vm0, %v2118_v29 }
 0x162 PF: > { %s13_s14 = sadd.s32 1, %s2330_s14   ;;  %s4087_s12 = smov %s2326_s13 }
 0x163   : > { %p10_p5 = scmp.ge.s32.totalorder %s13_s14, 4   ;;  %s4088_s13 = smov %s4090_s15 }
 0x165   :  { %12 = sbr.rel (!%p10_p5) target bundleno = 2 (0x2), region = 69 }

</bundles_post_ra>
